<compile_context>
chip_gen: v7x
topology: tpu7x:2x2x1
jax: 0.10.0
libtpu: 0.0.40
codegen_flags: <defaults>
</compile_context>

<pallas_src>
from functools import partial

import jax
import jax.numpy as jnp
from jax import lax
from jax.experimental import pallas as pl
from jax.experimental.pallas import tpu as pltpu


# ------------------------------ Pallas kernel ------------------------------ #
def _lightconv_kernel(xp_ref, w1_ref, w2_ref, shift2_ref, out_ref, pw_ref, *, k):
    # xp_ref:     (1, Hp, Wp, C1+1) bf16  zero-padded NHWC input + ones channel
    # w1_ref:     (C1+1, C2)        bf16  1x1 weight with BN1 scale folded;
    #                                     last row = BN1 shift (bias trick)
    # w2_ref:     (k*k, C2)         f32   depthwise weight with BN2 scale folded
    # shift2_ref: (1, C2)           f32   BN2 shift
    # out_ref:    (1, H, W, C2)     f32
    # pw_ref:     (Hp, Wp, C2)      f32   VMEM scratch: BN1 output, zero border
    Hp = pw_ref.shape[0]
    _, H, W, C2 = out_ref.shape

    # Stage 1: pointwise 1x1 conv + BN1 on the MXU.  Row-wise 2-D matmuls avoid
    # any in-kernel reshape; the padded border rows/cols of xp are all-zero
    # (including the ones channel), so pw_ref ends up holding exactly the
    # zero-padded BN1 output that the depthwise conv needs.
    for r in range(Hp):
        pw_ref[r] = jnp.dot(xp_ref[0, r], w1_ref[...],
                            preferred_element_type=jnp.float32)

    # Stage 2: depthwise k x k conv + BN2 + ReLU.  The k*k taps are shifted
    # static slices of the VMEM-resident intermediate (no im2col), accumulated
    # in f32 on the VPU.
    acc = jnp.zeros((H, W, C2), jnp.float32)
    for dh in range(k):
        for dw in range(k):
            t = dh * k + dw
            acc = acc + pw_ref[dh:dh + H, dw:dw + W, :] * w2_ref[t:t + 1, :]

    out_ref[0] = jnp.maximum(acc + shift2_ref[...], 0.0).astype(out_ref.dtype)


# ------------------------------ host wrapper ------------------------------- #
def lightconv(x, w1, g1, b1, m1, v1, w2, g2, b2, m2, v2, *, k, eps=1e-3):
    """LightConv forward: ReLU(BN2(DWConv_k(BN1(Conv1x1(x))))).  NCHW in/out."""
    N, C1, H, W = x.shape
    C2 = w1.shape[0]
    p = k // 2                                   # autopad(k, None, d=1)
    Hp, Wp = H + 2 * p, W + 2 * p
    Cin = C1 + 1

    # Fold eval-mode BN into the (linear) convolutions.
    s1 = g1 / jnp.sqrt(v1 + eps)
    w1f = (w1.reshape(C2, C1) * s1[:, None]).T                       # (C1, C2)
    shift1 = (b1 - m1 * s1)[None, :]                                 # (1, C2)
    w1_aug = jnp.concatenate([w1f, shift1], axis=0).astype(jnp.bfloat16)

    s2 = g2 / jnp.sqrt(v2 + eps)
    w2f = (jnp.transpose(w2[:, 0], (1, 2, 0)) * s2).reshape(k * k, C2)
    w2f = w2f.astype(jnp.float32)                                    # (k*k, C2)
    shift2 = (b2 - m2 * s2)[None, :].astype(jnp.float32)             # (1, C2)

    # Layout glue only to honor the PyTorch NCHW contract; internally NHWC.
    x_nhwc = jnp.transpose(x, (0, 2, 3, 1))
    ones = jnp.ones((N, H, W, 1), x.dtype)        # carries BN1 shift + padding
    xa = jnp.concatenate([x_nhwc, ones], axis=-1)
    xa = jnp.pad(xa, ((0, 0), (p, p), (p, p), (0, 0))).astype(jnp.bfloat16)

    out_nhwc = pl.pallas_call(
        partial(_lightconv_kernel, k=k),
        out_shape=jax.ShapeDtypeStruct((N, H, W, C2), jnp.float32),
        grid_spec=pltpu.PrefetchScalarGridSpec(
            num_scalar_prefetch=0,
            grid=(N,),
            in_specs=[
                pl.BlockSpec((1, Hp, Wp, Cin), lambda n: (n, 0, 0, 0)),
                pl.BlockSpec((Cin, C2), lambda n: (0, 0)),
                pl.BlockSpec((k * k, C2), lambda n: (0, 0)),
                pl.BlockSpec((1, C2), lambda n: (0, 0)),
            ],
            out_specs=pl.BlockSpec((1, H, W, C2), lambda n: (n, 0, 0, 0)),
            scratch_shapes=[pltpu.VMEM((Hp, Wp, C2), jnp.float32)],
        ),
        compiler_params=pltpu.CompilerParams(
            dimension_semantics=("parallel",),
            vmem_limit_bytes=32 * 1024 * 1024,
        ),
    )(xa, w1_aug, w2f, shift2)

    return jnp.transpose(out_nhwc, (0, 3, 1, 2))


# --------------------------------- main ------------------------------------ #
if __name__ == "__main__":
    N, C1, C2, H, W, k = 2, 4, 8, 16, 16, 3
    eps = 1e-3          # BatchNorm2d(eps=0.001) as written in the module

    key = jax.random.PRNGKey(0)
    ks = jax.random.split(key, 11)
    x = jax.random.normal(ks[0], (N, C1, H, W), jnp.float32)
    w1 = 0.1 * jax.random.normal(ks[1], (C2, C1, 1, 1), jnp.float32)
    g1 = 1.0 + 0.1 * jax.random.normal(ks[2], (C2,), jnp.float32)
    b1 = 0.1 * jax.random.normal(ks[3], (C2,), jnp.float32)
    m1 = 0.1 * jax.random.normal(ks[4], (C2,), jnp.float32)
    v1 = jnp.abs(1.0 + 0.1 * jax.random.normal(ks[5], (C2,), jnp.float32))
    w2 = 0.1 * jax.random.normal(ks[6], (C2, 1, k, k), jnp.float32)
    g2 = 1.0 + 0.1 * jax.random.normal(ks[7], (C2,), jnp.float32)
    b2 = 0.1 * jax.random.normal(ks[8], (C2,), jnp.float32)
    m2 = 0.1 * jax.random.normal(ks[9], (C2,), jnp.float32)
    v2 = jnp.abs(1.0 + 0.1 * jax.random.normal(ks[10], (C2,), jnp.float32))

    out = lightconv(x, w1, g1, b1, m1, v1, w2, g2, b2, m2, v2, k=k, eps=eps)
    out = jax.block_until_ready(out)
    assert out.shape == (N, C2, H, W)

    p = k // 2
    s1 = g1 / jnp.sqrt(v1 + eps)
    s2 = g2 / jnp.sqrt(v2 + eps)

    # Reference A: exact module semantics in f32 (loose tol: kernel carries the
    # activations / 1x1 weight in bf16).
    y = lax.conv_general_dilated(x, w1, (1, 1), ((0, 0), (0, 0)),
                                 dimension_numbers=("NCHW", "OIHW", "NCHW"))
    y = y * s1[None, :, None, None] + (b1 - m1 * s1)[None, :, None, None]
    y = lax.conv_general_dilated(y, w2, (1, 1), ((p, p), (p, p)),
                                 dimension_numbers=("NCHW", "OIHW", "NCHW"),
                                 feature_group_count=C2)
    ref_a = jnp.maximum(
        y * s2[None, :, None, None] + (b2 - m2 * s2)[None, :, None, None], 0.0)
    err_a = float(jnp.max(jnp.abs(out - ref_a)))
    assert jnp.allclose(out, ref_a, atol=5e-2, rtol=5e-2), err_a

    # Reference B: same bf16-quantized folded operands in f32 (tight check of
    # the Pallas kernel itself: indexing, tap accumulation, fusion).
    xq = x.astype(jnp.bfloat16).astype(jnp.float32)
    w1aq = jnp.concatenate([(w1.reshape(C2, C1) * s1[:, None]).T,
                            (b1 - m1 * s1)[None, :]], axis=0)
    w1aq = w1aq.astype(jnp.bfloat16).astype(jnp.float32)
    pw = jnp.einsum("nchw,cd->ndhw", xq, w1aq[:C1]) + w1aq[C1][None, :, None, None]
    pwp = jnp.pad(pw, ((0, 0), (0, 0), (p, p), (p, p)))
    w2s = jnp.transpose(w2[:, 0], (1, 2, 0)) * s2                    # (k, k, C2)
    acc = jnp.zeros((N, C2, H, W), jnp.float32)
    for dh in range(k):
        for dw in range(k):
            acc = acc + pwp[:, :, dh:dh + H, dw:dw + W] * w2s[dh, dw][None, :, None, None]
    ref_b = jnp.maximum(acc + (b2 - m2 * s2)[None, :, None, None], 0.0)
    err_b = float(jnp.max(jnp.abs(out - ref_b)))
    assert jnp.allclose(out, ref_b, atol=1e-3, rtol=1e-3), err_b

    print("KERNEL_OK")
</pallas_src>

<mosaic_0001>
module attributes {stable_mosaic.version = 11 : i64} {
  func.func @_lightconv_kernel(%arg0: i32, %arg1: memref<1x18x18x5xbf16, #tpu.memory_space<vmem>>, %arg2: memref<5x8xbf16, #tpu.memory_space<vmem>>, %arg3: memref<9x8xf32, #tpu.memory_space<vmem>>, %arg4: memref<1x8xf32, #tpu.memory_space<vmem>>, %arg5: memref<1x16x16x8xf32, #tpu.memory_space<vmem>>, %arg6: memref<18x18x8xf32, #tpu.memory_space<vmem>>) attributes {dimension_semantics = [#tpu.dimension_semantics<parallel>], iteration_bounds = array<i64: 2>, scalar_prefetch = 0 : i64, scratch_operands = 1 : i64, tpu.core_type = #tpu.core_type<tc>, window_params = [{transform_indices = @transform_0, window_bounds = array<i64: 1, 18, 18, 5>}, {pipeline_mode = #tpu.pipeline_mode<synchronous>, transform_indices = @transform_1, window_bounds = array<i64: 5, 8>}, {pipeline_mode = #tpu.pipeline_mode<synchronous>, transform_indices = @transform_2, window_bounds = array<i64: 9, 8>}, {pipeline_mode = #tpu.pipeline_mode<synchronous>, transform_indices = @transform_3, window_bounds = array<i64: 1, 8>}, {transform_indices = @transform_4, window_bounds = array<i64: 1, 16, 16, 8>}]} {
    %c0 = arith.constant 0 : index
    %c0_0 = arith.constant 0 : index
    %c0_1 = arith.constant 0 : index
    %c0_2 = arith.constant 0 : index
    %0 = vector.load %arg1[%c0, %c0_0, %c0_1, %c0_2] : memref<1x18x18x5xbf16, #tpu.memory_space<vmem>>, vector<1x1x18x5xbf16>
    %1 = vector.shape_cast %0 : vector<1x1x18x5xbf16> to vector<18x5xbf16>
    %c0_3 = arith.constant 0 : index
    %c0_4 = arith.constant 0 : index
    %2 = vector.load %arg2[%c0_3, %c0_4] : memref<5x8xbf16, #tpu.memory_space<vmem>>, vector<5x8xbf16>
    %cst = arith.constant dense<0.000000e+00> : vector<18x8xf32>
    %3 = tpu.matmul %1, %2, %cst {dimension_numbers = #tpu.dot_dimension_numbers<[1], [0], [0], [1], [0, 0, 1, 1], [], []>} : vector<18x5xbf16>, vector<5x8xbf16>, vector<18x8xf32> -> vector<18x8xf32>
    %c0_5 = arith.constant 0 : index
    %c0_6 = arith.constant 0 : index
    %c0_7 = arith.constant 0 : index
    %4 = vector.load %arg6[%c0_5, %c0_6, %c0_7] : memref<18x18x8xf32, #tpu.memory_space<vmem>>, vector<1x18x8xf32>
    %5 = vector.shape_cast %4 : vector<1x18x8xf32> to vector<18x8xf32>
    %6 = vector.shape_cast %3 : vector<18x8xf32> to vector<1x18x8xf32>
    tpu.vector_store %arg6[%c0_5, %c0_6, %c0_7], %6 {strides = array<i32>} : memref<18x18x8xf32, #tpu.memory_space<vmem>>, vector<1x18x8xf32>,
    %c0_8 = arith.constant 0 : index
    %c1 = arith.constant 1 : index
    %c0_9 = arith.constant 0 : index
    %c0_10 = arith.constant 0 : index
    %7 = vector.load %arg1[%c0_8, %c1, %c0_9, %c0_10] : memref<1x18x18x5xbf16, #tpu.memory_space<vmem>>, vector<1x1x18x5xbf16>
    %8 = vector.shape_cast %7 : vector<1x1x18x5xbf16> to vector<18x5xbf16>
    %c0_11 = arith.constant 0 : index
    %c0_12 = arith.constant 0 : index
    %9 = vector.load %arg2[%c0_11, %c0_12] : memref<5x8xbf16, #tpu.memory_space<vmem>>, vector<5x8xbf16>
    %cst_13 = arith.constant dense<0.000000e+00> : vector<18x8xf32>
    %10 = tpu.matmul %8, %9, %cst_13 {dimension_numbers = #tpu.dot_dimension_numbers<[1], [0], [0], [1], [0, 0, 1, 1], [], []>} : vector<18x5xbf16>, vector<5x8xbf16>, vector<18x8xf32> -> vector<18x8xf32>
    %c1_14 = arith.constant 1 : index
    %c0_15 = arith.constant 0 : index
    %c0_16 = arith.constant 0 : index
    %11 = vector.load %arg6[%c1_14, %c0_15, %c0_16] : memref<18x18x8xf32, #tpu.memory_space<vmem>>, vector<1x18x8xf32>
    %12 = vector.shape_cast %11 : vector<1x18x8xf32> to vector<18x8xf32>
    %13 = vector.shape_cast %10 : vector<18x8xf32> to vector<1x18x8xf32>
    tpu.vector_store %arg6[%c1_14, %c0_15, %c0_16], %13 {strides = array<i32>} : memref<18x18x8xf32, #tpu.memory_space<vmem>>, vector<1x18x8xf32>,
    %c0_17 = arith.constant 0 : index
    %c2 = arith.constant 2 : index
    %c0_18 = arith.constant 0 : index
    %c0_19 = arith.constant 0 : index
    %14 = vector.load %arg1[%c0_17, %c2, %c0_18, %c0_19] : memref<1x18x18x5xbf16, #tpu.memory_space<vmem>>, vector<1x1x18x5xbf16>
    %15 = vector.shape_cast %14 : vector<1x1x18x5xbf16> to vector<18x5xbf16>
    %c0_20 = arith.constant 0 : index
    %c0_21 = arith.constant 0 : index
    %16 = vector.load %arg2[%c0_20, %c0_21] : memref<5x8xbf16, #tpu.memory_space<vmem>>, vector<5x8xbf16>
    %cst_22 = arith.constant dense<0.000000e+00> : vector<18x8xf32>
    %17 = tpu.matmul %15, %16, %cst_22 {dimension_numbers = #tpu.dot_dimension_numbers<[1], [0], [0], [1], [0, 0, 1, 1], [], []>} : vector<18x5xbf16>, vector<5x8xbf16>, vector<18x8xf32> -> vector<18x8xf32>
    %c2_23 = arith.constant 2 : index
    %c0_24 = arith.constant 0 : index
    %c0_25 = arith.constant 0 : index
    %18 = vector.load %arg6[%c2_23, %c0_24, %c0_25] : memref<18x18x8xf32, #tpu.memory_space<vmem>>, vector<1x18x8xf32>
    %19 = vector.shape_cast %18 : vector<1x18x8xf32> to vector<18x8xf32>
    %20 = vector.shape_cast %17 : vector<18x8xf32> to vector<1x18x8xf32>
    tpu.vector_store %arg6[%c2_23, %c0_24, %c0_25], %20 {strides = array<i32>} : memref<18x18x8xf32, #tpu.memory_space<vmem>>, vector<1x18x8xf32>,
    %c0_26 = arith.constant 0 : index
    %c3 = arith.constant 3 : index
    %c0_27 = arith.constant 0 : index
    %c0_28 = arith.constant 0 : index
    %21 = vector.load %arg1[%c0_26, %c3, %c0_27, %c0_28] : memref<1x18x18x5xbf16, #tpu.memory_space<vmem>>, vector<1x1x18x5xbf16>
    %22 = vector.shape_cast %21 : vector<1x1x18x5xbf16> to vector<18x5xbf16>
    %c0_29 = arith.constant 0 : index
    %c0_30 = arith.constant 0 : index
    %23 = vector.load %arg2[%c0_29, %c0_30] : memref<5x8xbf16, #tpu.memory_space<vmem>>, vector<5x8xbf16>
    %cst_31 = arith.constant dense<0.000000e+00> : vector<18x8xf32>
    %24 = tpu.matmul %22, %23, %cst_31 {dimension_numbers = #tpu.dot_dimension_numbers<[1], [0], [0], [1], [0, 0, 1, 1], [], []>} : vector<18x5xbf16>, vector<5x8xbf16>, vector<18x8xf32> -> vector<18x8xf32>
    %c3_32 = arith.constant 3 : index
    %c0_33 = arith.constant 0 : index
    %c0_34 = arith.constant 0 : index
    %25 = vector.load %arg6[%c3_32, %c0_33, %c0_34] : memref<18x18x8xf32, #tpu.memory_space<vmem>>, vector<1x18x8xf32>
    %26 = vector.shape_cast %25 : vector<1x18x8xf32> to vector<18x8xf32>
    %27 = vector.shape_cast %24 : vector<18x8xf32> to vector<1x18x8xf32>
    tpu.vector_store %arg6[%c3_32, %c0_33, %c0_34], %27 {strides = array<i32>} : memref<18x18x8xf32, #tpu.memory_space<vmem>>, vector<1x18x8xf32>,
    %c0_35 = arith.constant 0 : index
    %c4 = arith.constant 4 : index
    %c0_36 = arith.constant 0 : index
    %c0_37 = arith.constant 0 : index
    %28 = vector.load %arg1[%c0_35, %c4, %c0_36, %c0_37] : memref<1x18x18x5xbf16, #tpu.memory_space<vmem>>, vector<1x1x18x5xbf16>
    %29 = vector.shape_cast %28 : vector<1x1x18x5xbf16> to vector<18x5xbf16>
    %c0_38 = arith.constant 0 : index
    %c0_39 = arith.constant 0 : index
    %30 = vector.load %arg2[%c0_38, %c0_39] : memref<5x8xbf16, #tpu.memory_space<vmem>>, vector<5x8xbf16>
    %cst_40 = arith.constant dense<0.000000e+00> : vector<18x8xf32>
    %31 = tpu.matmul %29, %30, %cst_40 {dimension_numbers = #tpu.dot_dimension_numbers<[1], [0], [0], [1], [0, 0, 1, 1], [], []>} : vector<18x5xbf16>, vector<5x8xbf16>, vector<18x8xf32> -> vector<18x8xf32>
    %c4_41 = arith.constant 4 : index
    %c0_42 = arith.constant 0 : index
    %c0_43 = arith.constant 0 : index
    %32 = vector.load %arg6[%c4_41, %c0_42, %c0_43] : memref<18x18x8xf32, #tpu.memory_space<vmem>>, vector<1x18x8xf32>
    %33 = vector.shape_cast %32 : vector<1x18x8xf32> to vector<18x8xf32>
    %34 = vector.shape_cast %31 : vector<18x8xf32> to vector<1x18x8xf32>
    tpu.vector_store %arg6[%c4_41, %c0_42, %c0_43], %34 {strides = array<i32>} : memref<18x18x8xf32, #tpu.memory_space<vmem>>, vector<1x18x8xf32>,
    %c0_44 = arith.constant 0 : index
    %c5 = arith.constant 5 : index
    %c0_45 = arith.constant 0 : index
    %c0_46 = arith.constant 0 : index
    %35 = vector.load %arg1[%c0_44, %c5, %c0_45, %c0_46] : memref<1x18x18x5xbf16, #tpu.memory_space<vmem>>, vector<1x1x18x5xbf16>
    %36 = vector.shape_cast %35 : vector<1x1x18x5xbf16> to vector<18x5xbf16>
    %c0_47 = arith.constant 0 : index
    %c0_48 = arith.constant 0 : index
    %37 = vector.load %arg2[%c0_47, %c0_48] : memref<5x8xbf16, #tpu.memory_space<vmem>>, vector<5x8xbf16>
    %cst_49 = arith.constant dense<0.000000e+00> : vector<18x8xf32>
    %38 = tpu.matmul %36, %37, %cst_49 {dimension_numbers = #tpu.dot_dimension_numbers<[1], [0], [0], [1], [0, 0, 1, 1], [], []>} : vector<18x5xbf16>, vector<5x8xbf16>, vector<18x8xf32> -> vector<18x8xf32>
    %c5_50 = arith.constant 5 : index
    %c0_51 = arith.constant 0 : index
    %c0_52 = arith.constant 0 : index
    %39 = vector.load %arg6[%c5_50, %c0_51, %c0_52] : memref<18x18x8xf32, #tpu.memory_space<vmem>>, vector<1x18x8xf32>
    %40 = vector.shape_cast %39 : vector<1x18x8xf32> to vector<18x8xf32>
    %41 = vector.shape_cast %38 : vector<18x8xf32> to vector<1x18x8xf32>
    tpu.vector_store %arg6[%c5_50, %c0_51, %c0_52], %41 {strides = array<i32>} : memref<18x18x8xf32, #tpu.memory_space<vmem>>, vector<1x18x8xf32>,
    %c0_53 = arith.constant 0 : index
    %c6 = arith.constant 6 : index
    %c0_54 = arith.constant 0 : index
    %c0_55 = arith.constant 0 : index
    %42 = vector.load %arg1[%c0_53, %c6, %c0_54, %c0_55] : memref<1x18x18x5xbf16, #tpu.memory_space<vmem>>, vector<1x1x18x5xbf16>
    %43 = vector.shape_cast %42 : vector<1x1x18x5xbf16> to vector<18x5xbf16>
    %c0_56 = arith.constant 0 : index
    %c0_57 = arith.constant 0 : index
    %44 = vector.load %arg2[%c0_56, %c0_57] : memref<5x8xbf16, #tpu.memory_space<vmem>>, vector<5x8xbf16>
    %cst_58 = arith.constant dense<0.000000e+00> : vector<18x8xf32>
    %45 = tpu.matmul %43, %44, %cst_58 {dimension_numbers = #tpu.dot_dimension_numbers<[1], [0], [0], [1], [0, 0, 1, 1], [], []>} : vector<18x5xbf16>, vector<5x8xbf16>, vector<18x8xf32> -> vector<18x8xf32>
    %c6_59 = arith.constant 6 : index
    %c0_60 = arith.constant 0 : index
    %c0_61 = arith.constant 0 : index
    %46 = vector.load %arg6[%c6_59, %c0_60, %c0_61] : memref<18x18x8xf32, #tpu.memory_space<vmem>>, vector<1x18x8xf32>
    %47 = vector.shape_cast %46 : vector<1x18x8xf32> to vector<18x8xf32>
    %48 = vector.shape_cast %45 : vector<18x8xf32> to vector<1x18x8xf32>
    tpu.vector_store %arg6[%c6_59, %c0_60, %c0_61], %48 {strides = array<i32>} : memref<18x18x8xf32, #tpu.memory_space<vmem>>, vector<1x18x8xf32>,
    %c0_62 = arith.constant 0 : index
    %c7 = arith.constant 7 : index
    %c0_63 = arith.constant 0 : index
    %c0_64 = arith.constant 0 : index
    %49 = vector.load %arg1[%c0_62, %c7, %c0_63, %c0_64] : memref<1x18x18x5xbf16, #tpu.memory_space<vmem>>, vector<1x1x18x5xbf16>
    %50 = vector.shape_cast %49 : vector<1x1x18x5xbf16> to vector<18x5xbf16>
    %c0_65 = arith.constant 0 : index
    %c0_66 = arith.constant 0 : index
    %51 = vector.load %arg2[%c0_65, %c0_66] : memref<5x8xbf16, #tpu.memory_space<vmem>>, vector<5x8xbf16>
    %cst_67 = arith.constant dense<0.000000e+00> : vector<18x8xf32>
    %52 = tpu.matmul %50, %51, %cst_67 {dimension_numbers = #tpu.dot_dimension_numbers<[1], [0], [0], [1], [0, 0, 1, 1], [], []>} : vector<18x5xbf16>, vector<5x8xbf16>, vector<18x8xf32> -> vector<18x8xf32>
    %c7_68 = arith.constant 7 : index
    %c0_69 = arith.constant 0 : index
    %c0_70 = arith.constant 0 : index
    %53 = vector.load %arg6[%c7_68, %c0_69, %c0_70] : memref<18x18x8xf32, #tpu.memory_space<vmem>>, vector<1x18x8xf32>
    %54 = vector.shape_cast %53 : vector<1x18x8xf32> to vector<18x8xf32>
    %55 = vector.shape_cast %52 : vector<18x8xf32> to vector<1x18x8xf32>
    tpu.vector_store %arg6[%c7_68, %c0_69, %c0_70], %55 {strides = array<i32>} : memref<18x18x8xf32, #tpu.memory_space<vmem>>, vector<1x18x8xf32>,
    %c0_71 = arith.constant 0 : index
    %c8 = arith.constant 8 : index
    %c0_72 = arith.constant 0 : index
    %c0_73 = arith.constant 0 : index
    %56 = vector.load %arg1[%c0_71, %c8, %c0_72, %c0_73] : memref<1x18x18x5xbf16, #tpu.memory_space<vmem>>, vector<1x1x18x5xbf16>
    %57 = vector.shape_cast %56 : vector<1x1x18x5xbf16> to vector<18x5xbf16>
    %c0_74 = arith.constant 0 : index
    %c0_75 = arith.constant 0 : index
    %58 = vector.load %arg2[%c0_74, %c0_75] : memref<5x8xbf16, #tpu.memory_space<vmem>>, vector<5x8xbf16>
    %cst_76 = arith.constant dense<0.000000e+00> : vector<18x8xf32>
    %59 = tpu.matmul %57, %58, %cst_76 {dimension_numbers = #tpu.dot_dimension_numbers<[1], [0], [0], [1], [0, 0, 1, 1], [], []>} : vector<18x5xbf16>, vector<5x8xbf16>, vector<18x8xf32> -> vector<18x8xf32>
    %c8_77 = arith.constant 8 : index
    %c0_78 = arith.constant 0 : index
    %c0_79 = arith.constant 0 : index
    %60 = vector.load %arg6[%c8_77, %c0_78, %c0_79] : memref<18x18x8xf32, #tpu.memory_space<vmem>>, vector<1x18x8xf32>
    %61 = vector.shape_cast %60 : vector<1x18x8xf32> to vector<18x8xf32>
    %62 = vector.shape_cast %59 : vector<18x8xf32> to vector<1x18x8xf32>
    tpu.vector_store %arg6[%c8_77, %c0_78, %c0_79], %62 {strides = array<i32>} : memref<18x18x8xf32, #tpu.memory_space<vmem>>, vector<1x18x8xf32>,
    %c0_80 = arith.constant 0 : index
    %c9 = arith.constant 9 : index
    %c0_81 = arith.constant 0 : index
    %c0_82 = arith.constant 0 : index
    %63 = vector.load %arg1[%c0_80, %c9, %c0_81, %c0_82] : memref<1x18x18x5xbf16, #tpu.memory_space<vmem>>, vector<1x1x18x5xbf16>
    %64 = vector.shape_cast %63 : vector<1x1x18x5xbf16> to vector<18x5xbf16>
    %c0_83 = arith.constant 0 : index
    %c0_84 = arith.constant 0 : index
    %65 = vector.load %arg2[%c0_83, %c0_84] : memref<5x8xbf16, #tpu.memory_space<vmem>>, vector<5x8xbf16>
    %cst_85 = arith.constant dense<0.000000e+00> : vector<18x8xf32>
    %66 = tpu.matmul %64, %65, %cst_85 {dimension_numbers = #tpu.dot_dimension_numbers<[1], [0], [0], [1], [0, 0, 1, 1], [], []>} : vector<18x5xbf16>, vector<5x8xbf16>, vector<18x8xf32> -> vector<18x8xf32>
    %c9_86 = arith.constant 9 : index
    %c0_87 = arith.constant 0 : index
    %c0_88 = arith.constant 0 : index
    %67 = vector.load %arg6[%c9_86, %c0_87, %c0_88] : memref<18x18x8xf32, #tpu.memory_space<vmem>>, vector<1x18x8xf32>
    %68 = vector.shape_cast %67 : vector<1x18x8xf32> to vector<18x8xf32>
    %69 = vector.shape_cast %66 : vector<18x8xf32> to vector<1x18x8xf32>
    tpu.vector_store %arg6[%c9_86, %c0_87, %c0_88], %69 {strides = array<i32>} : memref<18x18x8xf32, #tpu.memory_space<vmem>>, vector<1x18x8xf32>,
    %c0_89 = arith.constant 0 : index
    %c10 = arith.constant 10 : index
    %c0_90 = arith.constant 0 : index
    %c0_91 = arith.constant 0 : index
    %70 = vector.load %arg1[%c0_89, %c10, %c0_90, %c0_91] : memref<1x18x18x5xbf16, #tpu.memory_space<vmem>>, vector<1x1x18x5xbf16>
    %71 = vector.shape_cast %70 : vector<1x1x18x5xbf16> to vector<18x5xbf16>
    %c0_92 = arith.constant 0 : index
    %c0_93 = arith.constant 0 : index
    %72 = vector.load %arg2[%c0_92, %c0_93] : memref<5x8xbf16, #tpu.memory_space<vmem>>, vector<5x8xbf16>
    %cst_94 = arith.constant dense<0.000000e+00> : vector<18x8xf32>
    %73 = tpu.matmul %71, %72, %cst_94 {dimension_numbers = #tpu.dot_dimension_numbers<[1], [0], [0], [1], [0, 0, 1, 1], [], []>} : vector<18x5xbf16>, vector<5x8xbf16>, vector<18x8xf32> -> vector<18x8xf32>
    %c10_95 = arith.constant 10 : index
    %c0_96 = arith.constant 0 : index
    %c0_97 = arith.constant 0 : index
    %74 = vector.load %arg6[%c10_95, %c0_96, %c0_97] : memref<18x18x8xf32, #tpu.memory_space<vmem>>, vector<1x18x8xf32>
    %75 = vector.shape_cast %74 : vector<1x18x8xf32> to vector<18x8xf32>
    %76 = vector.shape_cast %73 : vector<18x8xf32> to vector<1x18x8xf32>
    tpu.vector_store %arg6[%c10_95, %c0_96, %c0_97], %76 {strides = array<i32>} : memref<18x18x8xf32, #tpu.memory_space<vmem>>, vector<1x18x8xf32>,
    %c0_98 = arith.constant 0 : index
    %c11 = arith.constant 11 : index
    %c0_99 = arith.constant 0 : index
    %c0_100 = arith.constant 0 : index
    %77 = vector.load %arg1[%c0_98, %c11, %c0_99, %c0_100] : memref<1x18x18x5xbf16, #tpu.memory_space<vmem>>, vector<1x1x18x5xbf16>
    %78 = vector.shape_cast %77 : vector<1x1x18x5xbf16> to vector<18x5xbf16>
    %c0_101 = arith.constant 0 : index
    %c0_102 = arith.constant 0 : index
    %79 = vector.load %arg2[%c0_101, %c0_102] : memref<5x8xbf16, #tpu.memory_space<vmem>>, vector<5x8xbf16>
    %cst_103 = arith.constant dense<0.000000e+00> : vector<18x8xf32>
    %80 = tpu.matmul %78, %79, %cst_103 {dimension_numbers = #tpu.dot_dimension_numbers<[1], [0], [0], [1], [0, 0, 1, 1], [], []>} : vector<18x5xbf16>, vector<5x8xbf16>, vector<18x8xf32> -> vector<18x8xf32>
    %c11_104 = arith.constant 11 : index
    %c0_105 = arith.constant 0 : index
    %c0_106 = arith.constant 0 : index
    %81 = vector.load %arg6[%c11_104, %c0_105, %c0_106] : memref<18x18x8xf32, #tpu.memory_space<vmem>>, vector<1x18x8xf32>
    %82 = vector.shape_cast %81 : vector<1x18x8xf32> to vector<18x8xf32>
    %83 = vector.shape_cast %80 : vector<18x8xf32> to vector<1x18x8xf32>
    tpu.vector_store %arg6[%c11_104, %c0_105, %c0_106], %83 {strides = array<i32>} : memref<18x18x8xf32, #tpu.memory_space<vmem>>, vector<1x18x8xf32>,
    %c0_107 = arith.constant 0 : index
    %c12 = arith.constant 12 : index
    %c0_108 = arith.constant 0 : index
    %c0_109 = arith.constant 0 : index
    %84 = vector.load %arg1[%c0_107, %c12, %c0_108, %c0_109] : memref<1x18x18x5xbf16, #tpu.memory_space<vmem>>, vector<1x1x18x5xbf16>
    %85 = vector.shape_cast %84 : vector<1x1x18x5xbf16> to vector<18x5xbf16>
    %c0_110 = arith.constant 0 : index
    %c0_111 = arith.constant 0 : index
    %86 = vector.load %arg2[%c0_110, %c0_111] : memref<5x8xbf16, #tpu.memory_space<vmem>>, vector<5x8xbf16>
    %cst_112 = arith.constant dense<0.000000e+00> : vector<18x8xf32>
    %87 = tpu.matmul %85, %86, %cst_112 {dimension_numbers = #tpu.dot_dimension_numbers<[1], [0], [0], [1], [0, 0, 1, 1], [], []>} : vector<18x5xbf16>, vector<5x8xbf16>, vector<18x8xf32> -> vector<18x8xf32>
    %c12_113 = arith.constant 12 : index
    %c0_114 = arith.constant 0 : index
    %c0_115 = arith.constant 0 : index
    %88 = vector.load %arg6[%c12_113, %c0_114, %c0_115] : memref<18x18x8xf32, #tpu.memory_space<vmem>>, vector<1x18x8xf32>
    %89 = vector.shape_cast %88 : vector<1x18x8xf32> to vector<18x8xf32>
    %90 = vector.shape_cast %87 : vector<18x8xf32> to vector<1x18x8xf32>
    tpu.vector_store %arg6[%c12_113, %c0_114, %c0_115], %90 {strides = array<i32>} : memref<18x18x8xf32, #tpu.memory_space<vmem>>, vector<1x18x8xf32>,
    %c0_116 = arith.constant 0 : index
    %c13 = arith.constant 13 : index
    %c0_117 = arith.constant 0 : index
    %c0_118 = arith.constant 0 : index
    %91 = vector.load %arg1[%c0_116, %c13, %c0_117, %c0_118] : memref<1x18x18x5xbf16, #tpu.memory_space<vmem>>, vector<1x1x18x5xbf16>
    %92 = vector.shape_cast %91 : vector<1x1x18x5xbf16> to vector<18x5xbf16>
    %c0_119 = arith.constant 0 : index
    %c0_120 = arith.constant 0 : index
    %93 = vector.load %arg2[%c0_119, %c0_120] : memref<5x8xbf16, #tpu.memory_space<vmem>>, vector<5x8xbf16>
    %cst_121 = arith.constant dense<0.000000e+00> : vector<18x8xf32>
    %94 = tpu.matmul %92, %93, %cst_121 {dimension_numbers = #tpu.dot_dimension_numbers<[1], [0], [0], [1], [0, 0, 1, 1], [], []>} : vector<18x5xbf16>, vector<5x8xbf16>, vector<18x8xf32> -> vector<18x8xf32>
    %c13_122 = arith.constant 13 : index
    %c0_123 = arith.constant 0 : index
    %c0_124 = arith.constant 0 : index
    %95 = vector.load %arg6[%c13_122, %c0_123, %c0_124] : memref<18x18x8xf32, #tpu.memory_space<vmem>>, vector<1x18x8xf32>
    %96 = vector.shape_cast %95 : vector<1x18x8xf32> to vector<18x8xf32>
    %97 = vector.shape_cast %94 : vector<18x8xf32> to vector<1x18x8xf32>
    tpu.vector_store %arg6[%c13_122, %c0_123, %c0_124], %97 {strides = array<i32>} : memref<18x18x8xf32, #tpu.memory_space<vmem>>, vector<1x18x8xf32>,
    %c0_125 = arith.constant 0 : index
    %c14 = arith.constant 14 : index
    %c0_126 = arith.constant 0 : index
    %c0_127 = arith.constant 0 : index
    %98 = vector.load %arg1[%c0_125, %c14, %c0_126, %c0_127] : memref<1x18x18x5xbf16, #tpu.memory_space<vmem>>, vector<1x1x18x5xbf16>
    %99 = vector.shape_cast %98 : vector<1x1x18x5xbf16> to vector<18x5xbf16>
    %c0_128 = arith.constant 0 : index
    %c0_129 = arith.constant 0 : index
    %100 = vector.load %arg2[%c0_128, %c0_129] : memref<5x8xbf16, #tpu.memory_space<vmem>>, vector<5x8xbf16>
    %cst_130 = arith.constant dense<0.000000e+00> : vector<18x8xf32>
    %101 = tpu.matmul %99, %100, %cst_130 {dimension_numbers = #tpu.dot_dimension_numbers<[1], [0], [0], [1], [0, 0, 1, 1], [], []>} : vector<18x5xbf16>, vector<5x8xbf16>, vector<18x8xf32> -> vector<18x8xf32>
    %c14_131 = arith.constant 14 : index
    %c0_132 = arith.constant 0 : index
    %c0_133 = arith.constant 0 : index
    %102 = vector.load %arg6[%c14_131, %c0_132, %c0_133] : memref<18x18x8xf32, #tpu.memory_space<vmem>>, vector<1x18x8xf32>
    %103 = vector.shape_cast %102 : vector<1x18x8xf32> to vector<18x8xf32>
    %104 = vector.shape_cast %101 : vector<18x8xf32> to vector<1x18x8xf32>
    tpu.vector_store %arg6[%c14_131, %c0_132, %c0_133], %104 {strides = array<i32>} : memref<18x18x8xf32, #tpu.memory_space<vmem>>, vector<1x18x8xf32>,
    %c0_134 = arith.constant 0 : index
    %c15 = arith.constant 15 : index
    %c0_135 = arith.constant 0 : index
    %c0_136 = arith.constant 0 : index
    %105 = vector.load %arg1[%c0_134, %c15, %c0_135, %c0_136] : memref<1x18x18x5xbf16, #tpu.memory_space<vmem>>, vector<1x1x18x5xbf16>
    %106 = vector.shape_cast %105 : vector<1x1x18x5xbf16> to vector<18x5xbf16>
    %c0_137 = arith.constant 0 : index
    %c0_138 = arith.constant 0 : index
    %107 = vector.load %arg2[%c0_137, %c0_138] : memref<5x8xbf16, #tpu.memory_space<vmem>>, vector<5x8xbf16>
    %cst_139 = arith.constant dense<0.000000e+00> : vector<18x8xf32>
    %108 = tpu.matmul %106, %107, %cst_139 {dimension_numbers = #tpu.dot_dimension_numbers<[1], [0], [0], [1], [0, 0, 1, 1], [], []>} : vector<18x5xbf16>, vector<5x8xbf16>, vector<18x8xf32> -> vector<18x8xf32>
    %c15_140 = arith.constant 15 : index
    %c0_141 = arith.constant 0 : index
    %c0_142 = arith.constant 0 : index
    %109 = vector.load %arg6[%c15_140, %c0_141, %c0_142] : memref<18x18x8xf32, #tpu.memory_space<vmem>>, vector<1x18x8xf32>
    %110 = vector.shape_cast %109 : vector<1x18x8xf32> to vector<18x8xf32>
    %111 = vector.shape_cast %108 : vector<18x8xf32> to vector<1x18x8xf32>
    tpu.vector_store %arg6[%c15_140, %c0_141, %c0_142], %111 {strides = array<i32>} : memref<18x18x8xf32, #tpu.memory_space<vmem>>, vector<1x18x8xf32>,
    %c0_143 = arith.constant 0 : index
    %c16 = arith.constant 16 : index
    %c0_144 = arith.constant 0 : index
    %c0_145 = arith.constant 0 : index
    %112 = vector.load %arg1[%c0_143, %c16, %c0_144, %c0_145] : memref<1x18x18x5xbf16, #tpu.memory_space<vmem>>, vector<1x1x18x5xbf16>
    %113 = vector.shape_cast %112 : vector<1x1x18x5xbf16> to vector<18x5xbf16>
    %c0_146 = arith.constant 0 : index
    %c0_147 = arith.constant 0 : index
    %114 = vector.load %arg2[%c0_146, %c0_147] : memref<5x8xbf16, #tpu.memory_space<vmem>>, vector<5x8xbf16>
    %cst_148 = arith.constant dense<0.000000e+00> : vector<18x8xf32>
    %115 = tpu.matmul %113, %114, %cst_148 {dimension_numbers = #tpu.dot_dimension_numbers<[1], [0], [0], [1], [0, 0, 1, 1], [], []>} : vector<18x5xbf16>, vector<5x8xbf16>, vector<18x8xf32> -> vector<18x8xf32>
    %c16_149 = arith.constant 16 : index
    %c0_150 = arith.constant 0 : index
    %c0_151 = arith.constant 0 : index
    %116 = vector.load %arg6[%c16_149, %c0_150, %c0_151] : memref<18x18x8xf32, #tpu.memory_space<vmem>>, vector<1x18x8xf32>
    %117 = vector.shape_cast %116 : vector<1x18x8xf32> to vector<18x8xf32>
    %118 = vector.shape_cast %115 : vector<18x8xf32> to vector<1x18x8xf32>
    tpu.vector_store %arg6[%c16_149, %c0_150, %c0_151], %118 {strides = array<i32>} : memref<18x18x8xf32, #tpu.memory_space<vmem>>, vector<1x18x8xf32>,
    %c0_152 = arith.constant 0 : index
    %c17 = arith.constant 17 : index
    %c0_153 = arith.constant 0 : index
    %c0_154 = arith.constant 0 : index
    %119 = vector.load %arg1[%c0_152, %c17, %c0_153, %c0_154] : memref<1x18x18x5xbf16, #tpu.memory_space<vmem>>, vector<1x1x18x5xbf16>
    %120 = vector.shape_cast %119 : vector<1x1x18x5xbf16> to vector<18x5xbf16>
    %c0_155 = arith.constant 0 : index
    %c0_156 = arith.constant 0 : index
    %121 = vector.load %arg2[%c0_155, %c0_156] : memref<5x8xbf16, #tpu.memory_space<vmem>>, vector<5x8xbf16>
    %cst_157 = arith.constant dense<0.000000e+00> : vector<18x8xf32>
    %122 = tpu.matmul %120, %121, %cst_157 {dimension_numbers = #tpu.dot_dimension_numbers<[1], [0], [0], [1], [0, 0, 1, 1], [], []>} : vector<18x5xbf16>, vector<5x8xbf16>, vector<18x8xf32> -> vector<18x8xf32>
    %c17_158 = arith.constant 17 : index
    %c0_159 = arith.constant 0 : index
    %c0_160 = arith.constant 0 : index
    %123 = vector.load %arg6[%c17_158, %c0_159, %c0_160] : memref<18x18x8xf32, #tpu.memory_space<vmem>>, vector<1x18x8xf32>
    %124 = vector.shape_cast %123 : vector<1x18x8xf32> to vector<18x8xf32>
    %125 = vector.shape_cast %122 : vector<18x8xf32> to vector<1x18x8xf32>
    tpu.vector_store %arg6[%c17_158, %c0_159, %c0_160], %125 {strides = array<i32>} : memref<18x18x8xf32, #tpu.memory_space<vmem>>, vector<1x18x8xf32>,
    %cst_161 = arith.constant 0.000000e+00 : f32
    %126 = vector.broadcast %cst_161 : f32 to vector<16x16x8xf32>
    %c0_162 = arith.constant 0 : index
    %c0_163 = arith.constant 0 : index
    %c0_164 = arith.constant 0 : index
    %127 = vector.load %arg6[%c0_162, %c0_163, %c0_164] : memref<18x18x8xf32, #tpu.memory_space<vmem>>, vector<16x16x8xf32>
    %c0_165 = arith.constant 0 : index
    %c0_166 = arith.constant 0 : index
    %128 = vector.load %arg3[%c0_165, %c0_166] : memref<9x8xf32, #tpu.memory_space<vmem>>, vector<1x8xf32>
    %129 = vector.shape_cast %128 : vector<1x8xf32> to vector<1x1x8xf32>
    %130 = vector.broadcast %129 : vector<1x1x8xf32> to vector<16x16x8xf32>
    %131 = arith.mulf %127, %130 : vector<16x16x8xf32>
    %132 = arith.addf %126, %131 : vector<16x16x8xf32>
    %c0_167 = arith.constant 0 : index
    %c1_168 = arith.constant 1 : index
    %c0_169 = arith.constant 0 : index
    %133 = vector.load %arg6[%c0_167, %c1_168, %c0_169] : memref<18x18x8xf32, #tpu.memory_space<vmem>>, vector<16x16x8xf32>
    %c1_170 = arith.constant 1 : index
    %c0_171 = arith.constant 0 : index
    %134 = vector.load %arg3[%c1_170, %c0_171] : memref<9x8xf32, #tpu.memory_space<vmem>>, vector<1x8xf32>
    %135 = vector.shape_cast %134 : vector<1x8xf32> to vector<1x1x8xf32>
    %136 = vector.broadcast %135 : vector<1x1x8xf32> to vector<16x16x8xf32>
    %137 = arith.mulf %133, %136 : vector<16x16x8xf32>
    %138 = arith.addf %132, %137 : vector<16x16x8xf32>
    %c0_172 = arith.constant 0 : index
    %c2_173 = arith.constant 2 : index
    %c0_174 = arith.constant 0 : index
    %139 = vector.load %arg6[%c0_172, %c2_173, %c0_174] : memref<18x18x8xf32, #tpu.memory_space<vmem>>, vector<16x16x8xf32>
    %c2_175 = arith.constant 2 : index
    %c0_176 = arith.constant 0 : index
    %140 = vector.load %arg3[%c2_175, %c0_176] : memref<9x8xf32, #tpu.memory_space<vmem>>, vector<1x8xf32>
    %141 = vector.shape_cast %140 : vector<1x8xf32> to vector<1x1x8xf32>
    %142 = vector.broadcast %141 : vector<1x1x8xf32> to vector<16x16x8xf32>
    %143 = arith.mulf %139, %142 : vector<16x16x8xf32>
    %144 = arith.addf %138, %143 : vector<16x16x8xf32>
    %c1_177 = arith.constant 1 : index
    %c0_178 = arith.constant 0 : index
    %c0_179 = arith.constant 0 : index
    %145 = vector.load %arg6[%c1_177, %c0_178, %c0_179] : memref<18x18x8xf32, #tpu.memory_space<vmem>>, vector<16x16x8xf32>
    %c3_180 = arith.constant 3 : index
    %c0_181 = arith.constant 0 : index
    %146 = vector.load %arg3[%c3_180, %c0_181] : memref<9x8xf32, #tpu.memory_space<vmem>>, vector<1x8xf32>
    %147 = vector.shape_cast %146 : vector<1x8xf32> to vector<1x1x8xf32>
    %148 = vector.broadcast %147 : vector<1x1x8xf32> to vector<16x16x8xf32>
    %149 = arith.mulf %145, %148 : vector<16x16x8xf32>
    %150 = arith.addf %144, %149 : vector<16x16x8xf32>
    %c1_182 = arith.constant 1 : index
    %c1_183 = arith.constant 1 : index
    %c0_184 = arith.constant 0 : index
    %151 = vector.load %arg6[%c1_182, %c1_183, %c0_184] : memref<18x18x8xf32, #tpu.memory_space<vmem>>, vector<16x16x8xf32>
    %c4_185 = arith.constant 4 : index
    %c0_186 = arith.constant 0 : index
    %152 = vector.load %arg3[%c4_185, %c0_186] : memref<9x8xf32, #tpu.memory_space<vmem>>, vector<1x8xf32>
    %153 = vector.shape_cast %152 : vector<1x8xf32> to vector<1x1x8xf32>
    %154 = vector.broadcast %153 : vector<1x1x8xf32> to vector<16x16x8xf32>
    %155 = arith.mulf %151, %154 : vector<16x16x8xf32>
    %156 = arith.addf %150, %155 : vector<16x16x8xf32>
    %c1_187 = arith.constant 1 : index
    %c2_188 = arith.constant 2 : index
    %c0_189 = arith.constant 0 : index
    %157 = vector.load %arg6[%c1_187, %c2_188, %c0_189] : memref<18x18x8xf32, #tpu.memory_space<vmem>>, vector<16x16x8xf32>
    %c5_190 = arith.constant 5 : index
    %c0_191 = arith.constant 0 : index
    %158 = vector.load %arg3[%c5_190, %c0_191] : memref<9x8xf32, #tpu.memory_space<vmem>>, vector<1x8xf32>
    %159 = vector.shape_cast %158 : vector<1x8xf32> to vector<1x1x8xf32>
    %160 = vector.broadcast %159 : vector<1x1x8xf32> to vector<16x16x8xf32>
    %161 = arith.mulf %157, %160 : vector<16x16x8xf32>
    %162 = arith.addf %156, %161 : vector<16x16x8xf32>
    %c2_192 = arith.constant 2 : index
    %c0_193 = arith.constant 0 : index
    %c0_194 = arith.constant 0 : index
    %163 = vector.load %arg6[%c2_192, %c0_193, %c0_194] : memref<18x18x8xf32, #tpu.memory_space<vmem>>, vector<16x16x8xf32>
    %c6_195 = arith.constant 6 : index
    %c0_196 = arith.constant 0 : index
    %164 = vector.load %arg3[%c6_195, %c0_196] : memref<9x8xf32, #tpu.memory_space<vmem>>, vector<1x8xf32>
    %165 = vector.shape_cast %164 : vector<1x8xf32> to vector<1x1x8xf32>
    %166 = vector.broadcast %165 : vector<1x1x8xf32> to vector<16x16x8xf32>
    %167 = arith.mulf %163, %166 : vector<16x16x8xf32>
    %168 = arith.addf %162, %167 : vector<16x16x8xf32>
    %c2_197 = arith.constant 2 : index
    %c1_198 = arith.constant 1 : index
    %c0_199 = arith.constant 0 : index
    %169 = vector.load %arg6[%c2_197, %c1_198, %c0_199] : memref<18x18x8xf32, #tpu.memory_space<vmem>>, vector<16x16x8xf32>
    %c7_200 = arith.constant 7 : index
    %c0_201 = arith.constant 0 : index
    %170 = vector.load %arg3[%c7_200, %c0_201] : memref<9x8xf32, #tpu.memory_space<vmem>>, vector<1x8xf32>
    %171 = vector.shape_cast %170 : vector<1x8xf32> to vector<1x1x8xf32>
    %172 = vector.broadcast %171 : vector<1x1x8xf32> to vector<16x16x8xf32>
    %173 = arith.mulf %169, %172 : vector<16x16x8xf32>
    %174 = arith.addf %168, %173 : vector<16x16x8xf32>
    %c2_202 = arith.constant 2 : index
    %c2_203 = arith.constant 2 : index
    %c0_204 = arith.constant 0 : index
    %175 = vector.load %arg6[%c2_202, %c2_203, %c0_204] : memref<18x18x8xf32, #tpu.memory_space<vmem>>, vector<16x16x8xf32>
    %c8_205 = arith.constant 8 : index
    %c0_206 = arith.constant 0 : index
    %176 = vector.load %arg3[%c8_205, %c0_206] : memref<9x8xf32, #tpu.memory_space<vmem>>, vector<1x8xf32>
    %177 = vector.shape_cast %176 : vector<1x8xf32> to vector<1x1x8xf32>
    %178 = vector.broadcast %177 : vector<1x1x8xf32> to vector<16x16x8xf32>
    %179 = arith.mulf %175, %178 : vector<16x16x8xf32>
    %180 = arith.addf %174, %179 : vector<16x16x8xf32>
    %c0_207 = arith.constant 0 : index
    %c0_208 = arith.constant 0 : index
    %181 = vector.load %arg4[%c0_207, %c0_208] : memref<1x8xf32, #tpu.memory_space<vmem>>, vector<1x8xf32>
    %182 = vector.shape_cast %181 : vector<1x8xf32> to vector<1x1x8xf32>
    %183 = vector.broadcast %182 : vector<1x1x8xf32> to vector<16x16x8xf32>
    %184 = arith.addf %180, %183 : vector<16x16x8xf32>
    %cst_209 = arith.constant 0.000000e+00 : f32
    %185 = vector.broadcast %cst_209 : f32 to vector<16x16x8xf32>
    %186 = arith.maximumf %184, %185 : vector<16x16x8xf32>
    %c0_210 = arith.constant 0 : index
    %c0_211 = arith.constant 0 : index
    %c0_212 = arith.constant 0 : index
    %c0_213 = arith.constant 0 : index
    %187 = vector.load %arg5[%c0_210, %c0_211, %c0_212, %c0_213] : memref<1x16x16x8xf32, #tpu.memory_space<vmem>>, vector<1x16x16x8xf32>
    %188 = vector.shape_cast %187 : vector<1x16x16x8xf32> to vector<16x16x8xf32>
    %189 = vector.shape_cast %186 : vector<16x16x8xf32> to vector<1x16x16x8xf32>
    tpu.vector_store %arg5[%c0_210, %c0_211, %c0_212, %c0_213], %189 {strides = array<i32>} : memref<1x16x16x8xf32, #tpu.memory_space<vmem>>, vector<1x16x16x8xf32>,
    return
  }
  func.func @transform_0(%arg0: i32) -> (i32, i32, i32, i32) {
    %c0_i32 = arith.constant 0 : i32
    %c0_i32_0 = arith.constant 0 : i32
    %c0_i32_1 = arith.constant 0 : i32
    %c0_i32_2 = arith.constant 0 : i32
    return %arg0, %c0_i32, %c0_i32_0, %c0_i32_1 : i32, i32, i32, i32
  }
  func.func @transform_1(%arg0: i32) -> (i32, i32) {
    %c0_i32 = arith.constant 0 : i32
    %c0_i32_0 = arith.constant 0 : i32
    %c0_i32_1 = arith.constant 0 : i32
    return %c0_i32, %c0_i32_0 : i32, i32
  }
  func.func @transform_2(%arg0: i32) -> (i32, i32) {
    %c0_i32 = arith.constant 0 : i32
    %c0_i32_0 = arith.constant 0 : i32
    %c0_i32_1 = arith.constant 0 : i32
    return %c0_i32, %c0_i32_0 : i32, i32
  }
  func.func @transform_3(%arg0: i32) -> (i32, i32) {
    %c0_i32 = arith.constant 0 : i32
    %c0_i32_0 = arith.constant 0 : i32
    %c0_i32_1 = arith.constant 0 : i32
    return %c0_i32, %c0_i32_0 : i32, i32
  }
  func.func @transform_4(%arg0: i32) -> (i32, i32, i32, i32) {
    %c0_i32 = arith.constant 0 : i32
    %c0_i32_0 = arith.constant 0 : i32
    %c0_i32_1 = arith.constant 0 : i32
    %c0_i32_2 = arith.constant 0 : i32
    return %arg0, %c0_i32, %c0_i32_0, %c0_i32_1 : i32, i32, i32, i32
  }
}

</mosaic_0001>

<bundles_post_ra>
// kernel: tpu_custom_call.1
= control target key start
LH: loop header
LB: loop body
LE: loop exit
PB: predicated region body
PF: predicated region fallthrough
CT: control target
= control target key end

     0   :  { %s2999_s15 = smov 0   ;;  %s3801_s0 = inlined_call_operand.vmem [shape: bf16[2,18,18,5], index: 0, kind: input, shape index: {}]   ;;  %s3802_s1 = inlined_call_operand.vmem [shape: bf16[5,8], index: 1, kind: input, shape index: {}]   ;;  %s3803_s2 = inlined_call_operand.vmem [shape: f32[9,8], index: 2, kind: input, shape index: {}]   ;;  %s3804_s3 = inlined_call_operand.vmem [shape: f32[1,8], index: 3, kind: input, shape index: {}]   ;;  %s3805_s4 = inlined_call_operand.vmem [shape: f32[2,16,16,8], index: 4, kind: output, shape index: {}]  }
   0x1 LB: > { %s2603_s16 = sadd.s32 4294967295, %s2971_s15   ;;  %p2607_p0 = scmp.ge.s32.totalorder %s2971_s15, 1  ;;  %s2971_s15 = sphi %s2999_s15, %s14_s15  }
   0x2   : > { %p162_p1 = scmp.lt.s32.totalorder %s2971_s15, 3 }
   0x4   : > { %p163_p2 = pnand %p2607_p0, %p162_p1 }
   0x5   : > { %v202_v0 = vld [vmem:[%s3802_s1] sm:$0x7] (!%p163_p2)  ;;  %vm218_vm0 = vcmask (!%p163_p2), 1041408   ;;  %vm219_vm1 = vcmask (!%p163_p2), 1042432   ;;  %p188_p3 = scmp.lt.s32.totalorder (!%p163_p2), %s2603_s16, 1  ;;  %v2973_v1 = vmov (!%p163_p2), 65535  }
   0x6   : > { %166 = sbr.rel (%p163_p2) target bundleno = 403 (0x193), region = 36  ;;  %v220_v2 = vsel (!%p163_p2), %vm218_vm0, 4294967295, %v2973_v1  ;;  %v282_v3 = vld [vmem:[%s3802_s1] sm:$0x7] (!%p163_p2)  ;;  %vm211_vm2 = vcmask (!%p163_p2), 39936   ;;  %vm276_vm3 = vcmask (!%p163_p2), 58368  }
   0x7   : > { %v356_v4 = vld [vmem:[%s3802_s1] sm:$0x7] (!%p163_p2)  ;;  %v3016_v5 = vsel (!%p163_p2), %vm219_vm1, %v220_v2, 0  ;;  %vm273_vm4 = vcmask (!%p163_p2), 64512  }
   0x8   : > { %v430_v6 = vld [vmem:[%s3802_s1] sm:$0x7] (!%p163_p2)  ;;  %v223_v7 = vand.u32 (!%p163_p2), %v3016_v5, %v202_v0  ;;  %v298_v8 = vand.u32 (!%p163_p2), %v282_v3, %v3016_v5  ;;  %v372_v9 = vand.u32 (!%p163_p2), %v356_v4, %v3016_v5 }
   0x9   : > { %v446_v10 = vand.u32 (!%p163_p2), %v430_v6, %v3016_v5  ;;  %v504_v11 = vld [vmem:[%s3802_s1] sm:$0x7] (!%p163_p2) }
   0xa   : > { %2801 = vmatprep.subr.bf16.mxu0 (!%p163_p2), %v223_v7  ;;  %2807 = vmatprep.subr.bf16.mxu1 (!%p163_p2), %v298_v8  ;;  %v578_v12 = vld [vmem:[%s3802_s1] sm:$0x7] (!%p163_p2)  ;;  %v520_v19 = vand.u32 (!%p163_p2), %v504_v11, %v3016_v5 }
   0xb   : > { %2802 = vmatpush3.bf16.msra.mxu0 (!%p163_p2), %v223_v7  ;;  %2808 = vmatpush3.bf16.msra.mxu1 (!%p163_p2), %v298_v8  ;;  %v594_v20 = vand.u32 (!%p163_p2), %v578_v12, %v3016_v5  ;;  %v652_v22 = vld [vmem:[%s3802_s1] sm:$0x7] (!%p163_p2) }
   0xc   : > { %2813 = vmatprep.subr.bf16.mxu0 (!%p163_p2), %v372_v9  ;;  %2819 = vmatprep.subr.bf16.mxu1 (!%p163_p2), %v446_v10  ;;  %v726_v23 = vld [vmem:[%s3802_s1] sm:$0x7] (!%p163_p2)  ;;  %v668_v27 = vand.u32 (!%p163_p2), %v652_v22, %v3016_v5 }
   0xd   : > { %s3807_s16 = smov (!%p188_p3, %s2603_s16), 1  ;;  %v742_v28 = vand.u32 %v726_v23, %v3016_v5  ;;  %v800_v29 = vld [vmem:[%s3802_s1] sm:$0x7] }
   0xe   : > { %s2909_s25 = smul.u32 216, %s3807_s16  ;;  %v874_v30 = vld [vmem:[%s3802_s1] sm:$0x7]  ;;  %v816_v35 = vand.u32 %v800_v29, %v3016_v5  ;;  %s2746_s30 = sshll.u32 %s3807_s16, 8 }
   0xf   : > { %v890_v36 = vand.u32 %v874_v30, %v3016_v5  ;;  %v948_v37 = vld [vmem:[%s3802_s1] sm:$0x7]  ;;  %s3315_s6 = scalar_lea.vmem %s3805_s4, %s2746_s30 }
  0x10   : > { %s3031_s28 = scalar_lea.vmem %s3801_s0, %s2909_s25  ;;  %v1022_v39 = vld [vmem:[%s3802_s1] sm:$0x7]  ;;  %v964_v43 = vand.u32 %v948_v37, %v3016_v5 }
  0x11   : > { %v2919_v13 = vld [vmem:[%s3031_s28] sm:$0xff]   ;;  %v2920_v14 = vld [vmem:[%s3031_s28 + $0xc] sm:$0xff]   ;;  %v2921_v15 = vld [vmem:[%s3031_s28 + $0x8] ss:$0 sps:$4 sm:$0x11]   ;;  %v1038_v44 = vand.u32 %v1022_v39, %v3016_v5 }
  0x12   : > { %2803 = vmatprep.mubr.msk.bf16.mxu0 %vm211_vm2, %v2919_v13  ;;  %v2923_v16 = vld [vmem:[%s3031_s28 + $0x18] sm:$0xff]   ;;  %2809 = vmatprep.mubr.msk.bf16.mxu1 %vm211_vm2, %v2920_v14  ;;  %v2922_v17 = vld [vmem:[%s3031_s28 + $0x14] ss:$0 sps:$4 sm:$0x11]   ;;  %v2924_v18 = vld [vmem:[%s3031_s28 + $0x24] sm:$0xff]  }
  0x13   : > { %2804 = vmatmul.mubr.msk.bf16.vlgmr.msra.gmra.mrb[0].mxu0 %vm211_vm2, %v2921_v15  ;;  %2810 = vmatmul.mubr.msk.bf16.vlgmr.msra.gmra.mrb[0].mxu1 %vm211_vm2, %v2922_v17  ;;  %v2925_v21 = vld [vmem:[%s3031_s28 + $0x20] ss:$0 sps:$4 sm:$0x11]   ;;  %v2926_v24 = vld [vmem:[%s3031_s28 + $0x2c] ss:$0 sps:$4 sm:$0x11]  }
  0x14   : > { %2814 = vmatpush3.bf16.msra.mxu0 %v372_v9  ;;  %2820 = vmatpush3.bf16.msra.mxu1 %v446_v10  ;;  %v2927_v25 = vld [vmem:[%s3031_s28 + $0x30] sm:$0xff]   ;;  %v2928_v26 = vld [vmem:[%s3031_s28 + $0x3c] sm:$0xff]   ;;  %v2929_v31 = vld [vmem:[%s3031_s28 + $0x38] ss:$0 sps:$4 sm:$0x11]  }
  0x15   : > { %2815 = vmatprep.mubr.msk.bf16.mxu0 %vm211_vm2, %v2923_v16  ;;  %2821 = vmatprep.mubr.msk.bf16.mxu1 %vm211_vm2, %v2924_v18  ;;  %v2931_v32 = vld [vmem:[%s3031_s28 + $0x48] sm:$0xff]   ;;  %v2930_v33 = vld [vmem:[%s3031_s28 + $0x44] ss:$0 sps:$4 sm:$0x11]   ;;  %v2932_v34 = vld [vmem:[%s3031_s28 + $0x54] sm:$0xff]  }
  0x16   : > { %2825 = vmatprep.subr.bf16.mxu0 %v520_v19  ;;  %2831 = vmatprep.subr.bf16.mxu1 %v594_v20  ;;  %v2933_v38 = vld [vmem:[%s3031_s28 + $0x50] ss:$0 sps:$4 sm:$0x11]   ;;  %v2934_v40 = vld [vmem:[%s3031_s28 + $0x5c] ss:$0 sps:$4 sm:$0x11]  }
  0x17   : > { %v2935_v41 = vld [vmem:[%s3031_s28 + $0x60] sm:$0xff]   ;;  %v2936_v42 = vld [vmem:[%s3031_s28 + $0x6c] sm:$0xff]   ;;  %v2937_v45 = vld [vmem:[%s3031_s28 + $0x68] ss:$0 sps:$4 sm:$0x11]  }
  0x18   : > { %v1096_v46 = vld [vmem:[%s3802_s1] sm:$0x7]  ;;  %v2938_v47 = vld [vmem:[%s3031_s28 + $0x74] ss:$0 sps:$4 sm:$0x11]   ;;  %v2939_v49 = vld [vmem:[%s3031_s28 + $0x78] sm:$0xff]  }
  0x19   : > { %v1170_v48 = vld [vmem:[%s3802_s1] sm:$0x7]  ;;  %v2940_v50 = vld [vmem:[%s3031_s28 + $0x84] sm:$0xff]   ;;  %v1112_v51 = vand.u32 %v1096_v46, %v3016_v5  ;;  %v2942_v55 = vld [vmem:[%s3031_s28 + $0x8c] ss:$0 sps:$4 sm:$0x11]  }
  0x1a   : > { %v1186_v52 = vand.u32 %v1170_v48, %v3016_v5  ;;  %v2941_v53 = vld [vmem:[%s3031_s28 + $0x80] ss:$0 sps:$4 sm:$0x11]   ;;  %v2943_v57 = vld [vmem:[%s3031_s28 + $0x90] sm:$0xff]   ;;  %v2947_v1 = vld [vmem:[%s3031_s28 + $0xa8] sm:$0xff]  }
  0x1b   : > { %2816 = vmatmul.mubr.msk.bf16.vlgmr.msra.gmra.mrb[4].mxu0 %vm211_vm2, %v2925_v21  ;;  %2822 = vmatmul.mubr.msk.bf16.vlgmr.msra.gmra.mrb[4].mxu1 %vm211_vm2, %v2926_v24  ;;  %v1244_v54 = vld [vmem:[%s3802_s1] sm:$0x7]  ;;  %v2945_v61 = vld [vmem:[%s3031_s28 + $0x98] ss:$0 sps:$4 sm:$0x11]   ;;  %v2953_v9 = vld [vmem:[%s3031_s28 + $0xcc] sm:$0xff]  }
  0x1c   : > { %2826 = vmatpush3.bf16.msra.mxu0 %v520_v19  ;;  %2832 = vmatpush3.bf16.msra.mxu1 %v594_v20  ;;  %v1318_v56 = vld [vmem:[%s3802_s1] sm:$0x7]  ;;  %v1260_v59 = vand.u32 %v1244_v54, %v3016_v5  ;;  %v2946_v63 = vld [vmem:[%s3031_s28 + $0xa4] ss:$0 sps:$4 sm:$0x11]   ;;  %v2948_v2 = vld [vmem:[%s3031_s28 + $0xb4] sm:$0xff]  }
  0x1d   : > { %2827 = vmatprep.mubr.msk.bf16.mxu0 %vm211_vm2, %v2927_v25  ;;  %2833 = vmatprep.mubr.msk.bf16.mxu1 %vm211_vm2, %v2928_v26  ;;  %v2944_v58 = vld [vmem:[%s3031_s28 + $0x9c] sm:$0xff]   ;;  %v1334_v60 = vand.u32 %v1318_v56, %v3016_v5  ;;  %v2949_v6 = vld [vmem:[%s3031_s28 + $0xb0] ss:$0 sps:$4 sm:$0x11]   ;;  %v3211_v56 = vld [vmem:[%s3803_s2 + $0x5] ss:$0 sm:$0xff] }
  0x1e   : > { %2837 = vmatprep.subr.bf16.mxu0 %v668_v27  ;;  %2843 = vmatprep.subr.bf16.mxu1 %v742_v28  ;;  %v1392_v62 = vld [vmem:[%s3802_s1] sm:$0x7]  ;;  %v2950_v7 = vld [vmem:[%s3031_s28 + $0xbc] ss:$0 sps:$4 sm:$0x11]  }
  0x1f   : > { %v1466_v0 = vld [vmem:[%s3802_s1] sm:$0x7]  ;;  %v1408_v3 = vand.u32 %v1392_v62, %v3016_v5  ;;  %v2954_v10 = vld [vmem:[%s3031_s28 + $0xd4] ss:$0 sps:$4 sm:$0x11]  }
  0x20   : > { %v1482_v4 = vand.u32 %v1466_v0, %v3016_v5  ;;  %v2951_v8 = vld [vmem:[%s3031_s28 + $0xc0] sm:$0xff]   ;;  %v2952_v5 = vld [vmem:[%s3031_s28 + $0xc8] ss:$0 sps:$4 sm:$0x11]  }
  0x21   : > { %v3170_v19 = vld [vmem:[%s3803_s2] ss:$0 sm:$0xff]  ;;  %v3175_v22 = vld [vmem:[%s3803_s2 + $0x1] ss:$0 sm:$0xff]  ;;  %v3181_v26 = vld [vmem:[%s3803_s2 + $0x3] ss:$0 sm:$0xff] }
  0x23   : > { %2828 = vmatmul.mubr.msk.bf16.vlgmr.msra.gmra.mrb[8].mxu0 %vm211_vm2, %v2929_v31  ;;  %2834 = vmatmul.mubr.msk.bf16.vlgmr.msra.gmra.mrb[8].mxu1 %vm211_vm2, %v2930_v33 }
  0x24   : > { %2838 = vmatpush3.bf16.msra.mxu0 %v668_v27  ;;  %2844 = vmatpush3.bf16.msra.mxu1 %v742_v28  ;;  %v3186_v27 = vld [vmem:[%s3803_s2 + $0x2] ss:$0 sm:$0xff] }
  0x25   : > { %2839 = vmatprep.mubr.msk.bf16.mxu0 %vm211_vm2, %v2931_v32  ;;  %2845 = vmatprep.mubr.msk.bf16.mxu1 %vm211_vm2, %v2932_v34 }
  0x26   : > { %2849 = vmatprep.subr.bf16.mxu0 %v816_v35  ;;  %2855 = vmatprep.subr.bf16.mxu1 %v890_v36 }
  0x2b   : > { %2840 = vmatmul.mubr.msk.bf16.vlgmr.msra.gmra.mrb[12].mxu0 %vm211_vm2, %v2933_v38  ;;  %2846 = vmatmul.mubr.msk.bf16.vlgmr.msra.gmra.mrb[12].mxu1 %vm211_vm2, %v2934_v40 }
  0x2c   : > { %2850 = vmatpush3.bf16.msra.mxu0 %v816_v35  ;;  %2856 = vmatpush3.bf16.msra.mxu1 %v890_v36 }
  0x2d   : > { %2851 = vmatprep.mubr.msk.bf16.mxu0 %vm211_vm2, %v2935_v41  ;;  %2857 = vmatprep.mubr.msk.bf16.mxu1 %vm211_vm2, %v2936_v42 }
  0x2e   : > { %2861 = vmatprep.subr.bf16.mxu0 %v964_v43  ;;  %2867 = vmatprep.subr.bf16.mxu1 %v1038_v44 }
  0x33   : > { %2852 = vmatmul.mubr.msk.bf16.vlgmr.msra.gmra.mrb[16].mxu0 %vm211_vm2, %v2937_v45  ;;  %2858 = vmatmul.mubr.msk.bf16.vlgmr.msra.gmra.mrb[16].mxu1 %vm211_vm2, %v2938_v47 }
  0x34   : > { %2862 = vmatpush3.bf16.msra.mxu0 %v964_v43  ;;  %2868 = vmatpush3.bf16.msra.mxu1 %v1038_v44 }
  0x35   : > { %2863 = vmatprep.mubr.msk.bf16.mxu0 %vm211_vm2, %v2939_v49  ;;  %2869 = vmatprep.mubr.msk.bf16.mxu1 %vm211_vm2, %v2940_v50 }
  0x36   : > { %2873 = vmatprep.subr.bf16.mxu0 %v1112_v51  ;;  %2879 = vmatprep.subr.bf16.mxu1 %v1186_v52 }
  0x3b   : > { %2864 = vmatmul.mubr.msk.bf16.vlgmr.msra.gmra.mrb[20].mxu0 %vm211_vm2, %v2941_v53  ;;  %2870 = vmatmul.mubr.msk.bf16.vlgmr.msra.gmra.mrb[20].mxu1 %vm211_vm2, %v2942_v55  ;;  %v3206_v55 = vld [vmem:[%s3803_s2 + $0x4] ss:$0 sm:$0xff] }
  0x3c   : > { %2874 = vmatpush3.bf16.msra.mxu0 %v1112_v51  ;;  %2880 = vmatpush3.bf16.msra.mxu1 %v1186_v52 }
  0x3d   : > { %2875 = vmatprep.mubr.msk.bf16.mxu0 %vm211_vm2, %v2943_v57  ;;  %2881 = vmatprep.mubr.msk.bf16.mxu1 %vm211_vm2, %v2944_v58 }
  0x3e   : > { %2885 = vmatprep.subr.bf16.mxu0 %v1260_v59  ;;  %2891 = vmatprep.subr.bf16.mxu1 %v1334_v60 }
  0x43   : > { %2876 = vmatmul.mubr.msk.bf16.vlgmr.msra.gmra.mrb[24].mxu0 %vm211_vm2, %v2945_v61  ;;  %2882 = vmatmul.mubr.msk.bf16.vlgmr.msra.gmra.mrb[24].mxu1 %vm211_vm2, %v2946_v63 }
  0x44   : > { %2886 = vmatpush3.bf16.msra.mxu0 %v1260_v59  ;;  %2892 = vmatpush3.bf16.msra.mxu1 %v1334_v60 }
  0x45   : > { %2887 = vmatprep.mubr.msk.bf16.mxu0 %vm211_vm2, %v2947_v1  ;;  %2893 = vmatprep.mubr.msk.bf16.mxu1 %vm211_vm2, %v2948_v2  ;;  %v3220_v1 = vld [vmem:[%s3803_s2 + $0x6] ss:$0 sm:$0xff] }
  0x46   : > { %2897 = vmatprep.subr.bf16.mxu0 %v1408_v3  ;;  %2903 = vmatprep.subr.bf16.mxu1 %v1482_v4 }
  0x4b   : > { %2888 = vmatmul.mubr.msk.bf16.vlgmr.msra.gmra.mrb[28].mxu0 %vm211_vm2, %v2949_v6  ;;  %2894 = vmatmul.mubr.msk.bf16.vlgmr.msra.gmra.mrb[28].mxu1 %vm211_vm2, %v2950_v7 }
  0x4c   : > { %2898 = vmatpush3.bf16.msra.mxu0 %v1408_v3  ;;  %2904 = vmatpush3.bf16.msra.mxu1 %v1482_v4 }
  0x4d   : > { %2899 = vmatprep.mubr.msk.bf16.mxu0 %vm211_vm2, %v2951_v8  ;;  %2905 = vmatprep.mubr.msk.bf16.mxu1 %vm211_vm2, %v2953_v9 }
  0x53   : > { %2900 = vmatmul.mubr.msk.bf16.vlgmr.msra.gmra.mrb[32].mxu0 %vm211_vm2, %v2952_v5  ;;  %2906 = vmatmul.mubr.msk.bf16.vlgmr.msra.gmra.mrb[32].mxu1 %vm211_vm2, %v2954_v10 }
  0xe6   : > { %v2805_v11 = vpop.f32.mrb[0].mxu0  ;;  %v2811_v12 = vpop.f32.mrb[0].mxu1 }
  0xe7   : > { %277 = vst.msk [vmem:[#allocation2 + $0x10] sm:$0x3] %vm276_vm3, %v2805_v11  ;;  %v259_v13 = vpop.f32.mrb[1].mxu0  ;;  %351 = vst.msk [vmem:[#allocation2 + $0x28] sm:$0x3] %vm276_vm3, %v2811_v12  ;;  %v334_v14 = vpop.f32.mrb[1].mxu1 }
  0xe8   : > { %274 = vst.msk [vmem:[#allocation2] sm:$0xff] %vm273_vm4, %v259_v13  ;;  %v2806_v15 = vpop.f32.mrb[2].mxu0  ;;  %349 = vst.msk [vmem:[#allocation2 + $0x18] sm:$0xff] %vm273_vm4, %v334_v14  ;;  %v2812_v16 = vpop.f32.mrb[2].mxu1 }
  0xe9   : > { %v262_v17 = vpop.f32.mrb[3].mxu0  ;;  %v337_v18 = vpop.f32.mrb[3].mxu1 }
  0xea   : > { %275 = vst.msk [vmem:[#allocation2 + $0x8] sm:$0xff] %vm273_vm4, %v262_v17  ;;  %350 = vst.msk [vmem:[#allocation2 + $0x20] sm:$0xff] %vm273_vm4, %v337_v18 }
  0xee   : > { %v2817_v20 = vpop.f32.mrb[4].mxu0  ;;  %v2823_v23 = vpop.f32.mrb[4].mxu1 }
  0xef   : > { %v1536_v21 = vld [vmem:[#allocation2] sm:$0xff]  ;;  %425 = vst.msk [vmem:[#allocation2 + $0x40] sm:$0x3] %vm276_vm3, %v2817_v20  ;;  %v408_v24 = vpop.f32.mrb[5].mxu0  ;;  %v1538_v25 = vld [vmem:[#allocation2 + $0x18] sm:$0xff]  ;;  %v482_v28 = vpop.f32.mrb[5].mxu1 }
  0xf0   : > { %499 = vst.msk [vmem:[#allocation2 + $0x58] sm:$0x3] %vm276_vm3, %v2823_v23  ;;  %v2818_v29 = vpop.f32.mrb[6].mxu0  ;;  %v1573_v30 = vmul.f32 %v3170_v19, %v1536_v21  ;;  %v2824_v34 = vpop.f32.mrb[6].mxu1  ;;  %v1575_v36 = vmul.f32 %v3170_v19, %v1538_v25  ;;  %v1876_v57 = vmul.f32 %v3181_v26, %v1538_v25 }
  0xf1   : > { %423 = vst.msk [vmem:[#allocation2 + $0x30] sm:$0xff] %vm273_vm4, %v408_v24  ;;  %v1537_v31 = vld [vmem:[#allocation2 + $0x8] sm:$0xff]  ;;  %497 = vst.msk [vmem:[#allocation2 + $0x48] sm:$0xff] %vm273_vm4, %v482_v28  ;;  %v411_v35 = vpop.f32.mrb[7].mxu0  ;;  %v1539_v42 = vld [vmem:[#allocation2 + $0x20] sm:$0xff]  ;;  %v485_v43 = vpop.f32.mrb[7].mxu1 }
  0xf2   : > { %v1637_v32 = vld [vmem:[#allocation2 + $0x1] sm:$0xff]  ;;  %v1638_v33 = vld [vmem:[#allocation2 + $0x9] sm:$0xff]  ;;  %v1574_v37 = vmul.f32 %v3170_v19, %v1537_v31  ;;  %424 = vst.msk [vmem:[#allocation2 + $0x38] sm:$0xff] %vm273_vm4, %v411_v35  ;;  %v1576_v46 = vmul.f32 %v3170_v19, %v1539_v42  ;;  %v1639_v47 = vld [vmem:[#allocation2 + $0x19] sm:$0xff]  ;;  %v1877_v60 = vmul.f32 %v3181_v26, %v1539_v42 }
  0xf3   : > { %v1674_v38 = vmul.f32 %v3175_v22, %v1637_v32  ;;  %v1675_v39 = vmul.f32 %v3175_v22, %v1638_v33  ;;  %v1738_v40 = vld [vmem:[#allocation2 + $0x2] sm:$0xff]  ;;  %v1739_v41 = vld [vmem:[#allocation2 + $0xa] sm:$0xff]  ;;  %v1740_v49 = vld [vmem:[#allocation2 + $0x1a] sm:$0xff]  ;;  %498 = vst.msk [vmem:[#allocation2 + $0x50] sm:$0xff] %vm273_vm4, %v485_v43  ;;  %v1676_v52 = vmul.f32 %v3175_v22, %v1639_v47  ;;  %v1977_v3 = vmul.f32 %v3206_v55, %v1639_v47 }
  0xf4   : > { %v1775_v44 = vmul.f32 %v3186_v27, %v1738_v40  ;;  %v1776_v45 = vmul.f32 %v3186_v27, %v1739_v41  ;;  %v1640_v48 = vld [vmem:[#allocation2 + $0x21] sm:$0xff]  ;;  %v1777_v58 = vmul.f32 %v3186_v27, %v1740_v49  ;;  %v2078_v6 = vmul.f32 %v3211_v56, %v1740_v49 }
  0xf5   : > { %v1706_v50 = vadd.f32 %v1674_v38, %v1573_v30  ;;  %v1707_v51 = vadd.f32 %v1675_v39, %v1574_v37  ;;  %v1677_v53 = vmul.f32 %v3175_v22, %v1640_v48  ;;  %v1741_v54 = vld [vmem:[#allocation2 + $0x22] sm:$0xff]  ;;  %v1708_v63 = vadd.f32 %v1676_v52, %v1575_v36 }
  0xf6   : > { %v1778_v59 = vmul.f32 %v3186_v27, %v1741_v54  ;;  %v2829_v2 = vpop.f32.mrb[8].mxu0  ;;  %v1978_v4 = vmul.f32 %v3206_v55, %v1640_v48  ;;  %v2079_v7 = vmul.f32 %v3211_v56, %v1741_v54  ;;  %v2835_v9 = vpop.f32.mrb[8].mxu1  ;;  %v3254_v49 = vld [vmem:[%s3803_s2 + $0x7] ss:$0 sm:$0xff] }
  0xf7   : > { %v1807_v61 = vadd.f32 %v1775_v44, %v1706_v50  ;;  %v1808_v62 = vadd.f32 %v1776_v45, %v1707_v51  ;;  %v1709_v0 = vadd.f32 %v1677_v53, %v1576_v46  ;;  %573 = vst.msk [vmem:[#allocation2 + $0x70] sm:$0x3] %vm276_vm3, %v2829_v2  ;;  %v556_v5 = vpop.f32.mrb[9].mxu0  ;;  %v1809_v10 = vadd.f32 %v1777_v58, %v1708_v63  ;;  %v630_v15 = vpop.f32.mrb[9].mxu1  ;;  %v3259_v50 = vld [vmem:[%s3803_s2 + $0x8] ss:$0 sm:$0xff] }
  0xf8   : > { %v1540_v8 = vld [vmem:[#allocation2 + $0x30] sm:$0xff]  ;;  %v1542_v14 = vld [vmem:[#allocation2 + $0x48] sm:$0xff]  ;;  %647 = vst.msk [vmem:[#allocation2 + $0x88] sm:$0x3] %vm276_vm3, %v2835_v9  ;;  %v2830_v16 = vpop.f32.mrb[10].mxu0  ;;  %v2836_v28 = vpop.f32.mrb[10].mxu1 }
  0xf9   : > { %v1810_v11 = vadd.f32 %v1778_v59, %v1709_v0  ;;  %v1908_v12 = vadd.f32 %v1876_v57, %v1807_v61  ;;  %v1909_v13 = vadd.f32 %v1877_v60, %v1808_v62  ;;  %571 = vst.msk [vmem:[#allocation2 + $0x60] sm:$0xff] %vm273_vm4, %v556_v5  ;;  %v1577_v17 = vmul.f32 %v3170_v19, %v1540_v8  ;;  %v1541_v23 = vld [vmem:[#allocation2 + $0x38] sm:$0xff]  ;;  %v559_v29 = vpop.f32.mrb[11].mxu0  ;;  %v633_v36 = vpop.f32.mrb[11].mxu1 }
  0xfa   : > { %v1878_v18 = vmul.f32 %v3181_v26, %v1540_v8  ;;  %v2179_v20 = vmul.f32 %v3220_v1, %v1540_v8  ;;  %v3233_v21 = vmul.f32 %v3170_v19, %v1542_v14  ;;  %v1641_v24 = vld [vmem:[#allocation2 + $0x31] sm:$0xff]  ;;  %v1642_v25 = vld [vmem:[#allocation2 + $0x39] sm:$0xff]  ;;  %645 = vst.msk [vmem:[#allocation2 + $0x78] sm:$0xff] %vm273_vm4, %v630_v15  ;;  %v3237_v32 = vmul.f32 %v3181_v26, %v1542_v14  ;;  %v3266_v63 = vld [vmem:[#allocation2 + $0x49] sm:$0xff] }
  0xfb   : > { %v2009_v30 = vadd.f32 %v1977_v3, %v1908_v12  ;;  %v2010_v31 = vadd.f32 %v1978_v4, %v1909_v13  ;;  %v3240_v33 = vmul.f32 %v3220_v1, %v1542_v14  ;;  %v1742_v34 = vld [vmem:[#allocation2 + $0x32] sm:$0xff]  ;;  %v1743_v35 = vld [vmem:[#allocation2 + $0x3a] sm:$0xff]  ;;  %572 = vst.msk [vmem:[#allocation2 + $0x68] sm:$0xff] %vm273_vm4, %v559_v29  ;;  %v1578_v38 = vmul.f32 %v3170_v19, %v1541_v23  ;;  %v3275_v9 = vld [vmem:[#allocation2 + $0x4a] sm:$0xff] }
  0xfc   : > { %v1910_v37 = vadd.f32 %v1878_v18, %v1809_v10  ;;  %v1678_v39 = vmul.f32 %v3175_v22, %v1641_v24  ;;  %v1679_v40 = vmul.f32 %v3175_v22, %v1642_v25  ;;  %646 = vst.msk [vmem:[#allocation2 + $0x80] sm:$0xff] %vm273_vm4, %v633_v36  ;;  %v1779_v43 = vmul.f32 %v3186_v27, %v1742_v34  ;;  %v3264_v57 = vld [vmem:[#allocation2 + $0x50] sm:$0xff]  ;;  %v3293_v29 = vld [vmem:[%s3804_s3] ss:$0 sm:$0xff] }
  0xfd   : > { %v2110_v41 = vadd.f32 %v2078_v6, %v2009_v30  ;;  %v2111_v42 = vadd.f32 %v2079_v7, %v2010_v31  ;;  %v1780_v44 = vmul.f32 %v3186_v27, %v1743_v35  ;;  %v1879_v47 = vmul.f32 %v3181_v26, %v1541_v23  ;;  %v3268_v0 = vld [vmem:[#allocation2 + $0x51] sm:$0xff] }
  0xfe   : > { %v1710_v45 = vadd.f32 %v1678_v39, %v1577_v17  ;;  %v1711_v46 = vadd.f32 %v1679_v40, %v1578_v38  ;;  %v1979_v48 = vmul.f32 %v3206_v55, %v1641_v24  ;;  %v1980_v52 = vmul.f32 %v3206_v55, %v1642_v25  ;;  %v2841_v58 = vpop.f32.mrb[12].mxu0  ;;  %v2847_v2 = vpop.f32.mrb[12].mxu1  ;;  %v3277_v5 = vld [vmem:[#allocation2 + $0x52] sm:$0xff] }
  0xff   : > { %v2211_v51 = vadd.f32 %v2179_v20, %v2110_v41  ;;  %v2080_v53 = vmul.f32 %v3211_v56, %v1742_v34  ;;  %v2081_v54 = vmul.f32 %v3211_v56, %v1743_v35  ;;  %v1911_v61 = vadd.f32 %v1879_v47, %v1810_v11  ;;  %721 = vst.msk [vmem:[#allocation2 + $0xa0] sm:$0x3] %vm276_vm3, %v2841_v58  ;;  %v704_v3 = vpop.f32.mrb[13].mxu0  ;;  %v778_v10 = vpop.f32.mrb[13].mxu1 }
 0x100   : > { %v1811_v59 = vadd.f32 %v1779_v43, %v1710_v45  ;;  %v1812_v60 = vadd.f32 %v1780_v44, %v1711_v46  ;;  %v2011_v62 = vadd.f32 %v1979_v48, %v1910_v37  ;;  %v2180_v4 = vmul.f32 %v3220_v1, %v1541_v23  ;;  %795 = vst.msk [vmem:[#allocation2 + $0xb8] sm:$0x3] %vm276_vm3, %v2847_v2  ;;  %v2842_v11 = vpop.f32.mrb[14].mxu0  ;;  %v2848_v16 = vpop.f32.mrb[14].mxu1 }
 0x101   : > { %v2280_v6 = vmul.f32 %v3254_v49, %v1641_v24  ;;  %v2281_v7 = vmul.f32 %v3254_v49, %v1642_v25  ;;  %v2381_v8 = vmul.f32 %v3259_v50, %v1742_v34  ;;  %719 = vst.msk [vmem:[#allocation2 + $0x90] sm:$0xff] %vm273_vm4, %v704_v3  ;;  %v2012_v12 = vadd.f32 %v1980_v52, %v1911_v61  ;;  %v707_v17 = vpop.f32.mrb[15].mxu0  ;;  %v781_v25 = vpop.f32.mrb[15].mxu1  ;;  %v1544_v61 = vld [vmem:[#allocation2 + $0x60] sm:$0xff] }
 0x102   : > { %v2112_v13 = vadd.f32 %v2080_v53, %v2011_v62  ;;  %v2382_v14 = vmul.f32 %v3259_v50, %v1743_v35  ;;  %v1580_v15 = vmul.f32 %v3170_v19, %v3264_v57  ;;  %793 = vst.msk [vmem:[#allocation2 + $0xa8] sm:$0xff] %vm273_vm4, %v778_v10  ;;  %v2212_v18 = vadd.f32 %v2180_v4, %v2111_v42 }
 0x103   : > { %v2312_v20 = vadd.f32 %v2280_v6, %v2211_v51  ;;  %v1680_v23 = vmul.f32 %v3175_v22, %v3266_v63  ;;  %v1681_v24 = vmul.f32 %v3175_v22, %v3268_v0  ;;  %720 = vst.msk [vmem:[#allocation2 + $0x98] sm:$0xff] %vm273_vm4, %v707_v17  ;;  %v2113_v28 = vadd.f32 %v2081_v54, %v2012_v12 }
 0x104   : > { %v1781_v30 = vmul.f32 %v3186_v27, %v3275_v9  ;;  %v1782_v31 = vmul.f32 %v3186_v27, %v3277_v5  ;;  %v1881_v34 = vmul.f32 %v3181_v26, %v3264_v57  ;;  %794 = vst.msk [vmem:[#allocation2 + $0xb0] sm:$0xff] %vm273_vm4, %v781_v25  ;;  %v2313_v35 = vadd.f32 %v2281_v7, %v2212_v18  ;;  %v1645_v18 = vld [vmem:[#allocation2 + $0x61] sm:$0xff] }
 0x105   : > { %v2413_v36 = vadd.f32 %v2381_v8, %v2312_v20  ;;  %v1712_v37 = vadd.f32 %v1680_v23, %v3233_v21  ;;  %v1713_v38 = vadd.f32 %v1681_v24, %v1580_v15  ;;  %v1912_v39 = vadd.f32 %v3237_v32, %v1811_v59  ;;  %v1646_v20 = vld [vmem:[#allocation2 + $0x69] sm:$0xff] }
 0x106   : > { %v1913_v40 = vadd.f32 %v1881_v34, %v1812_v60  ;;  %v1981_v41 = vmul.f32 %v3206_v55, %v3266_v63  ;;  %v1982_v42 = vmul.f32 %v3206_v55, %v3268_v0  ;;  %v2414_v43 = vadd.f32 %v2382_v14, %v2313_v35  ;;  %v2853_v47 = vpop.f32.mrb[16].mxu0  ;;  %v2859_v52 = vpop.f32.mrb[16].mxu1  ;;  %v1746_v23 = vld [vmem:[#allocation2 + $0x62] sm:$0xff] }
 0x107   : > { %v2452_v44 = vadd.f32 %v3293_v29, %v2413_v36  ;;  %v1813_v45 = vadd.f32 %v1781_v30, %v1712_v37  ;;  %v3310_v46 = vadd.f32 %v1782_v31, %v1713_v38  ;;  %v2082_v48 = vmul.f32 %v3211_v56, %v3275_v9  ;;  %869 = vst.msk [vmem:[#allocation2 + $0xd0] sm:$0x3] %vm276_vm3, %v2853_v47  ;;  %v852_v53 = vpop.f32.mrb[17].mxu0  ;;  %v926_v62 = vpop.f32.mrb[17].mxu1 }
 0x108   : > { %v2013_v21 = vadd.f32 %v1981_v41, %v1912_v39  ;;  %v2014_v32 = vadd.f32 %v1982_v42, %v1913_v40  ;;  %v2083_v51 = vmul.f32 %v3211_v56, %v3277_v5  ;;  %v2453_v54 = vadd.f32 %v3293_v29, %v2414_v43  ;;  %943 = vst.msk [vmem:[#allocation2 + $0xe8] sm:$0x3] %vm276_vm3, %v2859_v52  ;;  %v2854_v2 = vpop.f32.mrb[18].mxu0 }
 0x109   : > { %v2484_v58 = vmax.f32 %v2452_v44, 0.0  ;;  %v2182_v59 = vmul.f32 %v3220_v1, %v3264_v57  ;;  %v2213_v60 = vadd.f32 %v3240_v33, %v2112_v13  ;;  %867 = vst.msk [vmem:[#allocation2 + $0xc0] sm:$0xff] %vm273_vm4, %v852_v53  ;;  %v2282_v6 = vmul.f32 %v3254_v49, %v3266_v63  ;;  %v1546_v57 = vld [vmem:[#allocation2 + $0x78] sm:$0xff]  ;;  %941 = vst.msk [vmem:[#allocation2 + $0xd8] sm:$0xff] %vm273_vm4, %v926_v62  ;;  %v2860_v33 = vpop.f32.mrb[18].mxu1  ;;  %v855_v8 = vpop.f32.mrb[19].mxu0 }
 0x10a   : > { %v2114_v3 = vadd.f32 %v2082_v48, %v2013_v21  ;;  %v3328_v4 = vadd.f32 %v2083_v51, %v2014_v32  ;;  %v2283_v7 = vmul.f32 %v3254_v49, %v3268_v0  ;;  %v2485_v10 = vmax.f32 %v2453_v54, 0.0  ;;  %v1545_v63 = vld [vmem:[#allocation2 + $0x68] sm:$0xff]  ;;  %868 = vst.msk [vmem:[#allocation2 + $0xc8] sm:$0xff] %vm273_vm4, %v855_v8  ;;  %v929_v0 = vpop.f32.mrb[19].mxu1  ;;  %v1647_v33 = vld [vmem:[#allocation2 + $0x79] sm:$0xff] }
 0x10b   : > { %2516 = vst.msk [vmem:[%s3315_s6] sm:$0xff] %vm273_vm4, %v2484_v58  ;;  %v2214_v11 = vadd.f32 %v2182_v59, %v2113_v28  ;;  %v2383_v12 = vmul.f32 %v3259_v50, %v3275_v9  ;;  %v2384_v13 = vmul.f32 %v3259_v50, %v3277_v5  ;;  %v2314_v14 = vadd.f32 %v2282_v6, %v2213_v60  ;;  %v1747_v28 = vld [vmem:[#allocation2 + $0x6a] sm:$0xff] }
 0x10c   : > { %v1581_v15 = vmul.f32 %v3170_v19, %v1544_v61  ;;  %v1882_v16 = vmul.f32 %v3181_v26, %v1544_v61  ;;  %v2183_v17 = vmul.f32 %v3220_v1, %v1544_v61  ;;  %942 = vst.msk [vmem:[#allocation2 + $0xe0] sm:$0xff] %vm273_vm4, %v929_v0  ;;  %2517 = vst.msk [vmem:[%s3315_s6 + $0x8] sm:$0xff] %vm273_vm4, %v2485_v10  ;;  %v3372_v61 = vld [vmem:[#allocation2 + $0x80] sm:$0xff] }
 0x10d   : > { %v2315_v9 = vadd.f32 %v2283_v7, %v2214_v11  ;;  %v3349_v5 = vmul.f32 %v3170_v19, %v1546_v57  ;;  %v3352_v24 = vmul.f32 %v3181_v26, %v1546_v57  ;;  %v3355_v25 = vmul.f32 %v3220_v1, %v1546_v57  ;;  %v1748_v0 = vld [vmem:[#allocation2 + $0x7a] sm:$0xff] }
 0x10e   : > { %v2415_v30 = vadd.f32 %v2383_v12, %v2314_v14  ;;  %v1914_v31 = vadd.f32 %v1882_v16, %v1813_v45  ;;  %v2215_v34 = vadd.f32 %v2183_v17, %v2114_v3  ;;  %v1582_v35 = vmul.f32 %v3170_v19, %v1545_v63  ;;  %v2865_v40 = vpop.f32.mrb[20].mxu0  ;;  %v2871_v45 = vpop.f32.mrb[20].mxu1  ;;  %v1749_v14 = vld [vmem:[#allocation2 + $0x82] sm:$0xff] }
 0x10f   : > { %v2416_v36 = vadd.f32 %v2384_v13, %v2315_v9  ;;  %v1682_v37 = vmul.f32 %v3175_v22, %v1645_v18  ;;  %v1683_v38 = vmul.f32 %v3175_v22, %v1646_v20  ;;  %v1783_v39 = vmul.f32 %v3186_v27, %v1746_v23  ;;  %1017 = vst.msk [vmem:[#allocation2 + $0x100] sm:$0x3] %vm276_vm3, %v2865_v40  ;;  %v1000_v47 = vpop.f32.mrb[21].mxu0  ;;  %v1074_v52 = vpop.f32.mrb[21].mxu1  ;;  %v1648_v13 = vld [vmem:[#allocation2 + $0x81] sm:$0xff] }
 0x110   : > { %v2454_v41 = vadd.f32 %v3293_v29, %v2415_v30  ;;  %v1784_v42 = vmul.f32 %v3186_v27, %v1747_v28  ;;  %v1883_v43 = vmul.f32 %v3181_v26, %v1545_v63  ;;  %v1983_v44 = vmul.f32 %v3206_v55, %v1645_v18  ;;  %1091 = vst.msk [vmem:[#allocation2 + $0x118] sm:$0x3] %vm276_vm3, %v2871_v45  ;;  %v2866_v53 = vpop.f32.mrb[22].mxu0  ;;  %v2872_v62 = vpop.f32.mrb[22].mxu1 }
 0x111   : > { %v2455_v21 = vadd.f32 %v3293_v29, %v2416_v36  ;;  %v1714_v32 = vadd.f32 %v1682_v37, %v1581_v15  ;;  %v1715_v48 = vadd.f32 %v1683_v38, %v1582_v35  ;;  %v1984_v51 = vmul.f32 %v3206_v55, %v1646_v20  ;;  %1015 = vst.msk [vmem:[#allocation2 + $0xf0] sm:$0xff] %vm273_vm4, %v1000_v47  ;;  %v1003_v2 = vpop.f32.mrb[23].mxu0  ;;  %v1077_v8 = vpop.f32.mrb[23].mxu1 }
 0x112   : > { %v2486_v54 = vmax.f32 %v2454_v41, 0.0  ;;  %v1915_v58 = vadd.f32 %v1883_v43, %v3310_v46  ;;  %v2015_v59 = vadd.f32 %v1983_v44, %v1914_v31  ;;  %v2084_v60 = vmul.f32 %v3211_v56, %v1746_v23  ;;  %1089 = vst.msk [vmem:[#allocation2 + $0x108] sm:$0xff] %vm273_vm4, %v1074_v52  ;;  %1016 = vst.msk [vmem:[#allocation2 + $0xf8] sm:$0xff] %vm273_vm4, %v1003_v2 }
 0x113   : > { %v2487_v3 = vmax.f32 %v2455_v21, 0.0  ;;  %v1815_v6 = vadd.f32 %v1783_v39, %v1714_v32  ;;  %v1816_v7 = vadd.f32 %v1784_v42, %v1715_v48  ;;  %v2085_v57 = vmul.f32 %v3211_v56, %v1747_v28  ;;  %1090 = vst.msk [vmem:[#allocation2 + $0x110] sm:$0xff] %vm273_vm4, %v1077_v8 }
 0x114   : > { %2518 = vst.msk [vmem:[%s3315_s6 + $0x10] sm:$0xff] %vm273_vm4, %v2486_v54  ;;  %v2016_v46 = vadd.f32 %v1984_v51, %v1915_v58  ;;  %v2116_v10 = vadd.f32 %v2084_v60, %v2015_v59  ;;  %v2184_v11 = vmul.f32 %v3220_v1, %v1545_v63  ;;  %v2284_v12 = vmul.f32 %v3254_v49, %v1645_v18 }
 0x115   : > { %2519 = vst.msk [vmem:[%s3315_s6 + $0x18] sm:$0xff] %vm273_vm4, %v2487_v3  ;;  %v2285_v15 = vmul.f32 %v3254_v49, %v1646_v20  ;;  %v2385_v16 = vmul.f32 %v3259_v50, %v1746_v23  ;;  %v2386_v17 = vmul.f32 %v3259_v50, %v1747_v28  ;;  %v1584_v9 = vmul.f32 %v3170_v19, %v3372_v61 }
 0x116   : > { %v2117_v30 = vadd.f32 %v2085_v57, %v2016_v46  ;;  %v2216_v63 = vadd.f32 %v2184_v11, %v3328_v4  ;;  %v2316_v18 = vadd.f32 %v2284_v12, %v2215_v34  ;;  %v1684_v31 = vmul.f32 %v3175_v22, %v1647_v33  ;;  %v2877_v23 = vpop.f32.mrb[24].mxu0  ;;  %v2883_v4 = vpop.f32.mrb[24].mxu1  ;;  %v1550_v11 = vld [vmem:[#allocation2 + $0xa8] sm:$0xff] }
 0x117   : > { %v1685_v35 = vmul.f32 %v3175_v22, %v1648_v13  ;;  %v1785_v36 = vmul.f32 %v3186_v27, %v1748_v0  ;;  %v1786_v37 = vmul.f32 %v3186_v27, %v1749_v14  ;;  %v1885_v20 = vmul.f32 %v3181_v26, %v3372_v61  ;;  %1165 = vst.msk [vmem:[#allocation2 + $0x130] sm:$0x3] %vm276_vm3, %v2877_v23  ;;  %v1148_v34 = vpop.f32.mrb[25].mxu0  ;;  %v1222_v45 = vpop.f32.mrb[25].mxu1 }
 0x118   : > { %v2317_v28 = vadd.f32 %v2285_v15, %v2216_v63  ;;  %v2417_v38 = vadd.f32 %v2385_v16, %v2316_v18  ;;  %v1716_v39 = vadd.f32 %v1684_v31, %v3349_v5  ;;  %v1916_v40 = vadd.f32 %v3352_v24, %v1815_v6  ;;  %1239 = vst.msk [vmem:[#allocation2 + $0x148] sm:$0x3] %vm276_vm3, %v2883_v4  ;;  %v2878_v47 = vpop.f32.mrb[26].mxu0  ;;  %v2884_v48 = vpop.f32.mrb[26].mxu1  ;;  %v1548_v6 = vld [vmem:[#allocation2 + $0x90] sm:$0xff] }
 0x119   : > { %v1717_v41 = vadd.f32 %v1685_v35, %v1584_v9  ;;  %v1917_v42 = vadd.f32 %v1885_v20, %v1816_v7  ;;  %v1985_v43 = vmul.f32 %v3206_v55, %v1647_v33  ;;  %v1986_v44 = vmul.f32 %v3206_v55, %v1648_v13  ;;  %1163 = vst.msk [vmem:[#allocation2 + $0x120] sm:$0xff] %vm273_vm4, %v1148_v34  ;;  %v1151_v51 = vpop.f32.mrb[27].mxu0  ;;  %v1225_v59 = vpop.f32.mrb[27].mxu1  ;;  %v1649_v63 = vld [vmem:[#allocation2 + $0x91] sm:$0xff] }
 0x11a   : > { %v2418_v21 = vadd.f32 %v2386_v17, %v2317_v28  ;;  %v2456_v5 = vadd.f32 %v3293_v29, %v2417_v38  ;;  %v1817_v24 = vadd.f32 %v1785_v36, %v1716_v39  ;;  %v2086_v32 = vmul.f32 %v3211_v56, %v1748_v0  ;;  %1237 = vst.msk [vmem:[#allocation2 + $0x138] sm:$0xff] %vm273_vm4, %v1222_v45  ;;  %v1750_v18 = vld [vmem:[#allocation2 + $0x92] sm:$0xff]  ;;  %v1751_v36 = vld [vmem:[#allocation2 + $0x9a] sm:$0xff] }
 0x11b   : > { %v3406_v52 = vadd.f32 %v1786_v37, %v1717_v41  ;;  %v2017_v53 = vadd.f32 %v1985_v43, %v1916_v40  ;;  %v2018_v54 = vadd.f32 %v1986_v44, %v1917_v42  ;;  %v2087_v58 = vmul.f32 %v3211_v56, %v1749_v14  ;;  %1164 = vst.msk [vmem:[#allocation2 + $0x128] sm:$0xff] %vm273_vm4, %v1151_v51 }
 0x11c   : > { %v2457_v60 = vadd.f32 %v3293_v29, %v2418_v21  ;;  %v2488_v62 = vmax.f32 %v2456_v5, 0.0  ;;  %v2186_v2 = vmul.f32 %v3220_v1, %v3372_v61  ;;  %v2217_v3 = vadd.f32 %v3355_v25, %v2116_v10  ;;  %1238 = vst.msk [vmem:[#allocation2 + $0x140] sm:$0xff] %vm273_vm4, %v1225_v59  ;;  %v1549_v10 = vld [vmem:[#allocation2 + $0x98] sm:$0xff] }
 0x11d   : > { %v2118_v7 = vadd.f32 %v2086_v32, %v2017_v53  ;;  %v3415_v57 = vadd.f32 %v2087_v58, %v2018_v54  ;;  %v2286_v8 = vmul.f32 %v3254_v49, %v1647_v33  ;;  %v2287_v46 = vmul.f32 %v3254_v49, %v1648_v13  ;;  %v1650_v13 = vld [vmem:[#allocation2 + $0x99] sm:$0xff] }
 0x11e   : > { %v2489_v12 = vmax.f32 %v2457_v60, 0.0  ;;  %2520 = vst.msk [vmem:[%s3315_s6 + $0x20] sm:$0xff] %vm273_vm4, %v2488_v62  ;;  %v2218_v15 = vadd.f32 %v2186_v2, %v2117_v30  ;;  %v2387_v61 = vmul.f32 %v3259_v50, %v1748_v0  ;;  %v2388_v25 = vmul.f32 %v3259_v50, %v1749_v14  ;;  %v2889_v31 = vpop.f32.mrb[28].mxu0  ;;  %v2895_v37 = vpop.f32.mrb[28].mxu1  ;;  %v1551_v2 = vld [vmem:[#allocation2 + $0xb0] sm:$0xff] }
 0x11f   : > { %v2318_v16 = vadd.f32 %v2286_v8, %v2217_v3  ;;  %v1585_v17 = vmul.f32 %v3170_v19, %v1548_v6  ;;  %v1886_v9 = vmul.f32 %v3181_v26, %v1548_v6  ;;  %v2187_v33 = vmul.f32 %v3220_v1, %v1548_v6  ;;  %1313 = vst.msk [vmem:[#allocation2 + $0x160] sm:$0x3] %vm276_vm3, %v2889_v31  ;;  %v1296_v20 = vpop.f32.mrb[29].mxu0  ;;  %v1370_v40 = vpop.f32.mrb[29].mxu1 }
 0x120   : > { %2521 = vst.msk [vmem:[%s3315_s6 + $0x28] sm:$0xff] %vm273_vm4, %v2489_v12  ;;  %v2319_v35 = vadd.f32 %v2287_v46, %v2218_v15  ;;  %v3429_v30 = vmul.f32 %v3170_v19, %v1550_v11  ;;  %v3432_v0 = vmul.f32 %v3181_v26, %v1550_v11  ;;  %v3435_v14 = vmul.f32 %v3220_v1, %v1550_v11  ;;  %v2890_v4 = vpop.f32.mrb[30].mxu0  ;;  %v2896_v44 = vpop.f32.mrb[30].mxu1  ;;  %v1651_v46 = vld [vmem:[#allocation2 + $0xa9] sm:$0xff] }
 0x121   : > { %v2419_v23 = vadd.f32 %v2387_v61, %v2318_v16  ;;  %v1918_v28 = vadd.f32 %v1886_v9, %v1817_v24  ;;  %v2219_v38 = vadd.f32 %v2187_v33, %v2118_v7  ;;  %v1586_v39 = vmul.f32 %v3170_v19, %v1549_v10  ;;  %1387 = vst.msk [vmem:[#allocation2 + $0x178] sm:$0x3] %vm276_vm3, %v2895_v37  ;;  %v1299_v45 = vpop.f32.mrb[31].mxu0  ;;  %v1373_v32 = vpop.f32.mrb[31].mxu1  ;;  %v1753_v16 = vld [vmem:[#allocation2 + $0xb2] sm:$0xff] }
 0x122   : > { %1311 = vst.msk [vmem:[#allocation2 + $0x150] sm:$0xff] %vm273_vm4, %v1296_v20  ;;  %v2420_v34 = vadd.f32 %v2388_v25, %v2319_v35  ;;  %v1686_v41 = vmul.f32 %v3175_v22, %v1649_v63  ;;  %v1687_v42 = vmul.f32 %v3175_v22, %v1650_v13  ;;  %v1787_v43 = vmul.f32 %v3186_v27, %v1750_v18  ;;  %v1752_v25 = vld [vmem:[#allocation2 + $0xaa] sm:$0xff] }
 0x123   : > { %1385 = vst.msk [vmem:[#allocation2 + $0x168] sm:$0xff] %vm273_vm4, %v1370_v40  ;;  %v2458_v47 = vadd.f32 %v3293_v29, %v2419_v23  ;;  %v1788_v21 = vmul.f32 %v3186_v27, %v1751_v36  ;;  %v1887_v5 = vmul.f32 %v3181_v26, %v1549_v10  ;;  %v1987_v24 = vmul.f32 %v3206_v55, %v1649_v63 }
 0x124   : > { %1312 = vst.msk [vmem:[#allocation2 + $0x158] sm:$0xff] %vm273_vm4, %v1299_v45  ;;  %v2459_v48 = vadd.f32 %v3293_v29, %v2420_v34  ;;  %v1718_v51 = vadd.f32 %v1686_v41, %v1585_v17  ;;  %v1719_v53 = vadd.f32 %v1687_v42, %v1586_v39  ;;  %v1988_v54 = vmul.f32 %v3206_v55, %v1650_v13 }
 0x125   : > { %1386 = vst.msk [vmem:[#allocation2 + $0x170] sm:$0xff] %vm273_vm4, %v1373_v32  ;;  %v2490_v58 = vmax.f32 %v2458_v47, 0.0  ;;  %v1919_v59 = vadd.f32 %v1887_v5, %v3406_v52  ;;  %v2019_v60 = vadd.f32 %v1987_v24, %v1918_v28  ;;  %v2088_v62 = vmul.f32 %v3211_v56, %v1750_v18  ;;  %v1652_v52 = vld [vmem:[#allocation2 + $0xb1] sm:$0xff] }
 0x126   : > { %v2491_v3 = vmax.f32 %v2459_v48, 0.0  ;;  %v1819_v6 = vadd.f32 %v1787_v43, %v1718_v51  ;;  %v1820_v7 = vadd.f32 %v1788_v21, %v1719_v53  ;;  %v2089_v8 = vmul.f32 %v3211_v56, %v1751_v36  ;;  %v2901_v17 = vpop.f32.mrb[32].mxu0 }
 0x127   : > { %2522 = vst.msk [vmem:[%s3315_s6 + $0x30] sm:$0xff] %vm273_vm4, %v2490_v58  ;;  %v2020_v11 = vadd.f32 %v1988_v54, %v1919_v59  ;;  %v2120_v12 = vadd.f32 %v2088_v62, %v2019_v60  ;;  %v2188_v15 = vmul.f32 %v3220_v1, %v1549_v10  ;;  %v2288_v61 = vmul.f32 %v3254_v49, %v1649_v63  ;;  %v1444_v37 = vpop.f32.mrb[33].mxu0  ;;  %v2907_v10 = vpop.f32.mrb[32].mxu1 }
 0x128   : > { %2523 = vst.msk [vmem:[%s3315_s6 + $0x38] sm:$0xff] %vm273_vm4, %v2491_v3  ;;  %v2289_v9 = vmul.f32 %v3254_v49, %v1650_v13  ;;  %v2389_v33 = vmul.f32 %v3259_v50, %v1750_v18  ;;  %v2390_v31 = vmul.f32 %v3259_v50, %v1751_v36  ;;  %v1588_v35 = vmul.f32 %v3170_v19, %v1551_v2  ;;  %v2902_v39 = vpop.f32.mrb[34].mxu0  ;;  %v1518_v13 = vpop.f32.mrb[33].mxu1  ;;  %v1552_v3 = vld [vmem:[#allocation2 + $0xc0] sm:$0xff] }
 0x129   : > { %1461 = vst.msk [vmem:[#allocation2 + $0x190] sm:$0x3] %vm276_vm3, %v2901_v17  ;;  %v2121_v20 = vadd.f32 %v2089_v8, %v2020_v11  ;;  %v2220_v63 = vadd.f32 %v2188_v15, %v3415_v57  ;;  %v2320_v23 = vadd.f32 %v2288_v61, %v2219_v38  ;;  %v1688_v28 = vmul.f32 %v3175_v22, %v1651_v46  ;;  %v1447_v34 = vpop.f32.mrb[35].mxu0  ;;  %v2908_v57 = vpop.f32.mrb[34].mxu1  ;;  %v1554_v15 = vld [vmem:[#allocation2 + $0xd8] sm:$0xff] }
 0x12a   : > { %1459 = vst.msk [vmem:[#allocation2 + $0x180] sm:$0xff] %vm273_vm4, %v1444_v37  ;;  %v1689_v18 = vmul.f32 %v3175_v22, %v1652_v52  ;;  %v1789_v36 = vmul.f32 %v3186_v27, %v1752_v25  ;;  %v1790_v40 = vmul.f32 %v3186_v27, %v1753_v16  ;;  %v1889_v4 = vmul.f32 %v3181_v26, %v1551_v2  ;;  %v1521_v44 = vpop.f32.mrb[35].mxu1  ;;  %v1654_v37 = vld [vmem:[#allocation2 + $0xc9] sm:$0xff] }
 0x12b   : > { %1535 = vst.msk [vmem:[#allocation2 + $0x1a8] sm:$0x3] %vm276_vm3, %v2907_v10  ;;  %v2321_v38 = vadd.f32 %v2289_v9, %v2220_v63  ;;  %v2421_v41 = vadd.f32 %v2389_v33, %v2320_v23  ;;  %v1720_v42 = vadd.f32 %v1688_v28, %v3429_v30  ;;  %v1920_v43 = vadd.f32 %v3432_v0, %v1819_v6  ;;  %v1553_v33 = vld [vmem:[#allocation2 + $0xc8] sm:$0xff] }
 0x12c   : > { %1533 = vst.msk [vmem:[#allocation2 + $0x198] sm:$0xff] %vm273_vm4, %v1518_v13  ;;  %1460 = vst.msk [vmem:[#allocation2 + $0x188] sm:$0xff] %vm273_vm4, %v1447_v34  ;;  %v1721_v45 = vadd.f32 %v1689_v18, %v1588_v35  ;;  %v1921_v47 = vadd.f32 %v1889_v4, %v1820_v7  ;;  %v1989_v21 = vmul.f32 %v3206_v55, %v1651_v46  ;;  %v1653_v35 = vld [vmem:[#allocation2 + $0xc1] sm:$0xff]  ;;  %v1755_v63 = vld [vmem:[#allocation2 + $0xca] sm:$0xff] }
 0x12d   : > { %v1990_v5 = vmul.f32 %v3206_v55, %v1652_v52  ;;  %1534 = vst.msk [vmem:[#allocation2 + $0x1a0] sm:$0xff] %vm273_vm4, %v1521_v44  ;;  %v2422_v24 = vadd.f32 %v2390_v31, %v2321_v38  ;;  %v2460_v32 = vadd.f32 %v3293_v29, %v2421_v41  ;;  %v1821_v48 = vadd.f32 %v1789_v36, %v1720_v42 }
 0x12e   : > { %v2090_v51 = vmul.f32 %v3211_v56, %v1752_v25  ;;  %v1822_v30 = vadd.f32 %v1790_v40, %v1721_v45  ;;  %v2021_v0 = vadd.f32 %v1989_v21, %v1920_v43  ;;  %v2091_v54 = vmul.f32 %v3211_v56, %v1753_v16 }
 0x12f   : > { %v2022_v53 = vadd.f32 %v1990_v5, %v1921_v47  ;;  %v2461_v58 = vadd.f32 %v3293_v29, %v2422_v24  ;;  %v2492_v59 = vmax.f32 %v2460_v32, 0.0  ;;  %v2190_v60 = vmul.f32 %v3220_v1, %v1551_v2  ;;  %v1555_v32 = vld [vmem:[#allocation2 + $0xe0] sm:$0xff] }
 0x130   : > { %v2221_v62 = vadd.f32 %v3435_v14, %v2120_v12  ;;  %v2122_v6 = vadd.f32 %v2090_v51, %v2021_v0  ;;  %v2290_v8 = vmul.f32 %v3254_v49, %v1651_v46  ;;  %v2291_v11 = vmul.f32 %v3254_v49, %v1652_v52  ;;  %v1754_v52 = vld [vmem:[#allocation2 + $0xc2] sm:$0xff] }
 0x131   : > { %v3488_v7 = vadd.f32 %v2091_v54, %v2022_v53  ;;  %v2493_v61 = vmax.f32 %v2461_v58, 0.0  ;;  %2524 = vst.msk [vmem:[%s3315_s6 + $0x40] sm:$0xff] %vm273_vm4, %v2492_v59  ;;  %v2222_v17 = vadd.f32 %v2190_v60, %v2121_v20  ;;  %v2391_v9 = vmul.f32 %v3259_v50, %v1752_v25  ;;  %v1655_v54 = vld [vmem:[#allocation2 + $0xd9] sm:$0xff] }
 0x132   : > { %v2392_v2 = vmul.f32 %v3259_v50, %v1753_v16  ;;  %v2322_v14 = vadd.f32 %v2290_v8, %v2221_v62  ;;  %v1589_v12 = vmul.f32 %v3170_v19, %v1552_v3  ;;  %v1890_v31 = vmul.f32 %v3181_v26, %v1552_v3 }
 0x133   : > { %v2191_v46 = vmul.f32 %v3220_v1, %v1552_v3  ;;  %2525 = vst.msk [vmem:[%s3315_s6 + $0x48] sm:$0xff] %vm273_vm4, %v2493_v61  ;;  %v2323_v10 = vadd.f32 %v2291_v11, %v2222_v17  ;;  %v1591_v20 = vmul.f32 %v3170_v19, %v1554_v15  ;;  %v1892_v25 = vmul.f32 %v3181_v26, %v1554_v15  ;;  %v1756_v3 = vld [vmem:[#allocation2 + $0xda] sm:$0xff] }
 0x134   : > { %v3504_v16 = vmul.f32 %v3220_v1, %v1554_v15  ;;  %v2423_v23 = vadd.f32 %v2391_v9, %v2322_v14  ;;  %v1922_v28 = vadd.f32 %v1890_v31, %v1821_v48  ;;  %v1590_v13 = vmul.f32 %v3170_v19, %v1553_v33 }
 0x135   : > { %v2223_v39 = vadd.f32 %v2191_v46, %v2122_v6  ;;  %v2424_v18 = vadd.f32 %v2392_v2, %v2323_v10  ;;  %v1690_v36 = vmul.f32 %v3175_v22, %v1653_v35  ;;  %v1691_v40 = vmul.f32 %v3175_v22, %v1654_v37  ;;  %v1757_v6 = vld [vmem:[#allocation2 + $0xe2] sm:$0xff] }
 0x136   : > { %v1791_v4 = vmul.f32 %v3186_v27, %v1754_v52  ;;  %v2462_v34 = vadd.f32 %v3293_v29, %v2423_v23  ;;  %v1792_v57 = vmul.f32 %v3186_v27, %v1755_v63  ;;  %v1891_v38 = vmul.f32 %v3181_v26, %v1553_v33 }
 0x137   : > { %v1991_v41 = vmul.f32 %v3206_v55, %v1653_v35  ;;  %v2463_v42 = vadd.f32 %v3293_v29, %v2424_v18  ;;  %v1722_v43 = vadd.f32 %v1690_v36, %v1589_v12  ;;  %v1723_v44 = vadd.f32 %v1691_v40, %v1590_v13 }
 0x138   : > { %v1992_v45 = vmul.f32 %v3206_v55, %v1654_v37  ;;  %v2494_v47 = vmax.f32 %v2462_v34, 0.0  ;;  %v1923_v21 = vadd.f32 %v1891_v38, %v1822_v30  ;;  %v2092_v24 = vmul.f32 %v3211_v56, %v1754_v52  ;;  %v1656_v30 = vld [vmem:[#allocation2 + $0xe1] sm:$0xff]  ;;  %v1556_v34 = vld [vmem:[#allocation2 + $0xf0] sm:$0xff] }
 0x139   : > { %v2023_v5 = vadd.f32 %v1991_v41, %v1922_v28  ;;  %v2495_v48 = vmax.f32 %v2463_v42, 0.0  ;;  %v1823_v51 = vadd.f32 %v1791_v4, %v1722_v43  ;;  %v1824_v0 = vadd.f32 %v1792_v57, %v1723_v44  ;;  %v1558_v43 = vld [vmem:[#allocation2 + $0x108] sm:$0xff] }
 0x13a   : > { %v2093_v53 = vmul.f32 %v3211_v56, %v1755_v63  ;;  %2526 = vst.msk [vmem:[%s3315_s6 + $0x50] sm:$0xff] %vm273_vm4, %v2494_v47  ;;  %v2024_v58 = vadd.f32 %v1992_v45, %v1923_v21  ;;  %v2192_v60 = vmul.f32 %v3220_v1, %v1553_v33  ;;  %v2292_v62 = vmul.f32 %v3254_v49, %v1653_v35  ;;  %v1557_v21 = vld [vmem:[#allocation2 + $0xf8] sm:$0xff] }
 0x13b   : > { %v2124_v59 = vadd.f32 %v2092_v24, %v2023_v5  ;;  %2527 = vst.msk [vmem:[%s3315_s6 + $0x58] sm:$0xff] %vm273_vm4, %v2495_v48  ;;  %v2293_v8 = vmul.f32 %v3254_v49, %v1654_v37  ;;  %v2393_v11 = vmul.f32 %v3259_v50, %v1754_v52  ;;  %v2394_v15 = vmul.f32 %v3259_v50, %v1755_v63  ;;  %v3553_v5 = vld [vmem:[%s3803_s2] ss:$0 sm:$0xff] }
 0x13c   : > { %v1592_v61 = vmul.f32 %v3170_v19, %v1555_v32  ;;  %v2125_v17 = vadd.f32 %v2093_v53, %v2024_v58  ;;  %v2224_v9 = vadd.f32 %v2192_v60, %v3488_v7  ;;  %v2324_v2 = vadd.f32 %v2292_v62, %v2223_v39  ;;  %v1658_v53 = vld [vmem:[#allocation2 + $0xf9] sm:$0xff] }
 0x13d   : > { %v1692_v33 = vmul.f32 %v3175_v22, %v1655_v54  ;;  %v1693_v14 = vmul.f32 %v3175_v22, %v1656_v30  ;;  %v1793_v12 = vmul.f32 %v3186_v27, %v1756_v3  ;;  %v1794_v31 = vmul.f32 %v3186_v27, %v1757_v6 }
 0x13e   : > { %v1893_v46 = vmul.f32 %v3181_v26, %v1555_v32  ;;  %v2325_v35 = vadd.f32 %v2293_v8, %v2224_v9  ;;  %v2425_v37 = vadd.f32 %v2393_v11, %v2324_v2  ;;  %v1924_v10 = vadd.f32 %v1892_v25, %v1823_v51 }
 0x13f   : > { %v1724_v52 = vadd.f32 %v1692_v33, %v1591_v20  ;;  %v1725_v63 = vadd.f32 %v1693_v14, %v1592_v61  ;;  %v1993_v23 = vmul.f32 %v3206_v55, %v1655_v54  ;;  %v1994_v7 = vmul.f32 %v3206_v55, %v1656_v30  ;;  %v3574_v61 = vld [vmem:[%s3803_s2 + $0x1] ss:$0 sm:$0xff] }
 0x140   : > { %v1925_v19 = vadd.f32 %v1893_v46, %v1824_v0  ;;  %v2426_v28 = vadd.f32 %v2394_v15, %v2325_v35  ;;  %v2464_v39 = vadd.f32 %v3293_v29, %v2425_v37  ;;  %v2094_v13 = vmul.f32 %v3211_v56, %v1756_v3  ;;  %v1657_v0 = vld [vmem:[#allocation2 + $0xf1] sm:$0xff] }
 0x141   : > { %v1825_v22 = vadd.f32 %v1793_v12, %v1724_v52  ;;  %v1826_v27 = vadd.f32 %v1794_v31, %v1725_v63  ;;  %v2025_v18 = vadd.f32 %v1993_v23, %v1924_v10  ;;  %v2095_v36 = vmul.f32 %v3211_v56, %v1757_v6  ;;  %v3592_v52 = vld [vmem:[%s3803_s2 + $0x4] ss:$0 sm:$0xff] }
 0x142   : > { %v2026_v26 = vadd.f32 %v1994_v7, %v1925_v19  ;;  %v2465_v20 = vadd.f32 %v3293_v29, %v2426_v28  ;;  %v2496_v25 = vmax.f32 %v2464_v39, 0.0  ;;  %v2194_v40 = vmul.f32 %v3220_v1, %v1555_v32  ;;  %v3559_v32 = vld [vmem:[%s3803_s2 + $0x3] ss:$0 sm:$0xff]  ;;  %v3598_v7 = vld [vmem:[%s3803_s2 + $0x5] ss:$0 sm:$0xff]  ;;  %v1559_v28 = vld [vmem:[#allocation2 + $0x110] sm:$0xff] }
 0x143   : > { %v2225_v4 = vadd.f32 %v3504_v16, %v2124_v59  ;;  %v2126_v57 = vadd.f32 %v2094_v13, %v2025_v18  ;;  %v2294_v41 = vmul.f32 %v3254_v49, %v1655_v54  ;;  %v2295_v42 = vmul.f32 %v3254_v49, %v1656_v30  ;;  %v1758_v54 = vld [vmem:[#allocation2 + $0xf2] sm:$0xff]  ;;  %v1759_v30 = vld [vmem:[#allocation2 + $0xfa] sm:$0xff] }
 0x144   : > { %v3542_v38 = vadd.f32 %v2095_v36, %v2026_v26  ;;  %v2497_v44 = vmax.f32 %v2465_v20, 0.0  ;;  %2528 = vst.msk [vmem:[%s3315_s6 + $0x60] sm:$0xff] %vm273_vm4, %v2496_v25  ;;  %v2226_v56 = vadd.f32 %v2194_v40, %v2125_v17  ;;  %v2395_v45 = vmul.f32 %v3259_v50, %v1756_v3  ;;  %v1659_v26 = vld [vmem:[#allocation2 + $0x109] sm:$0xff]  ;;  %v3607_v20 = vld [vmem:[%s3803_s2 + $0x6] ss:$0 sm:$0xff] }
 0x145   : > { %v2396_v47 = vmul.f32 %v3259_v50, %v1757_v6  ;;  %v2326_v16 = vadd.f32 %v2294_v41, %v2225_v4  ;;  %v1593_v24 = vmul.f32 %v3553_v5, %v1556_v34  ;;  %v1894_v48 = vmul.f32 %v3559_v32, %v1556_v34  ;;  %v1660_v4 = vld [vmem:[#allocation2 + $0x111] sm:$0xff] }
 0x146   : > { %v2195_v51 = vmul.f32 %v3220_v1, %v1556_v34  ;;  %2529 = vst.msk [vmem:[%s3315_s6 + $0x68] sm:$0xff] %vm273_vm4, %v2497_v44  ;;  %v2327_v58 = vadd.f32 %v2295_v42, %v2226_v56  ;;  %v1595_v59 = vmul.f32 %v3553_v5, %v1558_v43  ;;  %v1896_v60 = vmul.f32 %v3559_v32, %v1558_v43  ;;  %v1760_v34 = vld [vmem:[#allocation2 + $0x10a] sm:$0xff] }
 0x147   : > { %v3568_v62 = vmul.f32 %v3220_v1, %v1558_v43  ;;  %v2427_v3 = vadd.f32 %v2395_v45, %v2326_v16  ;;  %v1926_v6 = vadd.f32 %v1894_v48, %v1825_v22  ;;  %v1594_v11 = vmul.f32 %v3553_v5, %v1557_v21  ;;  %v3581_v1 = vld [vmem:[%s3803_s2 + $0x2] ss:$0 sm:$0xff] }
 0x148   : > { %v2227_v8 = vadd.f32 %v2195_v51, %v2126_v57  ;;  %v2428_v15 = vadd.f32 %v2396_v47, %v2327_v58  ;;  %v1694_v17 = vmul.f32 %v3574_v61, %v1657_v0  ;;  %v1695_v9 = vmul.f32 %v3574_v61, %v1658_v53  ;;  %v1761_v57 = vld [vmem:[#allocation2 + $0x112] sm:$0xff] }
 0x149   : > { %v1795_v2 = vmul.f32 %v3581_v1, %v1758_v54  ;;  %v2466_v33 = vadd.f32 %v3293_v29, %v2427_v3  ;;  %v1796_v14 = vmul.f32 %v3581_v1, %v1759_v30  ;;  %v1895_v12 = vmul.f32 %v3559_v32, %v1557_v21 }
 0x14a   : > { %v1995_v31 = vmul.f32 %v3206_v55, %v1657_v0  ;;  %v2467_v46 = vadd.f32 %v3293_v29, %v2428_v15  ;;  %v1726_v35 = vadd.f32 %v1694_v17, %v1593_v24  ;;  %v1727_v37 = vadd.f32 %v1695_v9, %v1594_v11 }
 0x14b   : > { %v1996_v10 = vmul.f32 %v3592_v52, %v1658_v53  ;;  %v2498_v63 = vmax.f32 %v2466_v33, 0.0  ;;  %v1927_v19 = vadd.f32 %v1895_v12, %v1826_v27  ;;  %v2096_v55 = vmul.f32 %v3598_v7, %v1758_v54 }
 0x14c   : > { %v2027_v23 = vadd.f32 %v1995_v31, %v1926_v6  ;;  %v2499_v39 = vmax.f32 %v2467_v46, 0.0  ;;  %v1827_v22 = vadd.f32 %v1795_v2, %v1726_v35  ;;  %v1828_v13 = vadd.f32 %v1796_v14, %v1727_v37  ;;  %v1560_v31 = vld [vmem:[#allocation2 + $0x120] sm:$0xff] }
 0x14d   : > { %v2097_v18 = vmul.f32 %v3598_v7, %v1759_v30  ;;  %2530 = vst.msk [vmem:[%s3315_s6 + $0x70] sm:$0xff] %vm273_vm4, %v2498_v63  ;;  %v2028_v36 = vadd.f32 %v1996_v10, %v1927_v19  ;;  %v2196_v25 = vmul.f32 %v3607_v20, %v1557_v21  ;;  %v2296_v40 = vmul.f32 %v3254_v49, %v1657_v0  ;;  %v1562_v63 = vld [vmem:[#allocation2 + $0x138] sm:$0xff] }
 0x14e   : > { %v2128_v27 = vadd.f32 %v2096_v55, %v2027_v23  ;;  %2531 = vst.msk [vmem:[%s3315_s6 + $0x78] sm:$0xff] %vm273_vm4, %v2499_v39  ;;  %v2297_v41 = vmul.f32 %v3254_v49, %v1658_v53  ;;  %v2397_v42 = vmul.f32 %v3259_v50, %v1758_v54  ;;  %v2398_v43 = vmul.f32 %v3259_v50, %v1759_v30  ;;  %v3640_v55 = vld [vmem:[%s3803_s2 + $0x8] ss:$0 sm:$0xff] }
 0x14f   : > { %v1596_v44 = vmul.f32 %v3553_v5, %v1559_v28  ;;  %v2129_v56 = vadd.f32 %v2097_v18, %v2028_v36  ;;  %v2228_v45 = vadd.f32 %v2196_v25, %v3542_v38  ;;  %v2328_v47 = vadd.f32 %v2296_v40, %v2227_v8  ;;  %v1561_v39 = vld [vmem:[#allocation2 + $0x128] sm:$0xff] }
 0x150   : > { %v1696_v21 = vmul.f32 %v3574_v61, %v1659_v26  ;;  %v1697_v16 = vmul.f32 %v3574_v61, %v1660_v4  ;;  %v1797_v24 = vmul.f32 %v3581_v1, %v1760_v34  ;;  %v1798_v48 = vmul.f32 %v3581_v1, %v1761_v57  ;;  %v1662_v36 = vld [vmem:[#allocation2 + $0x129] sm:$0xff] }
 0x151   : > { %v1897_v51 = vmul.f32 %v3559_v32, %v1559_v28  ;;  %v2329_v0 = vadd.f32 %v2297_v41, %v2228_v45  ;;  %v2429_v53 = vadd.f32 %v2397_v42, %v2328_v47  ;;  %v1928_v50 = vadd.f32 %v1896_v60, %v1827_v22 }
 0x152   : > { %v1728_v54 = vadd.f32 %v1696_v21, %v1595_v59  ;;  %v1729_v58 = vadd.f32 %v1697_v16, %v1596_v44  ;;  %v1997_v3 = vmul.f32 %v3592_v52, %v1659_v26  ;;  %v1998_v38 = vmul.f32 %v3592_v52, %v1660_v4 }
 0x153   : > { %v1929_v30 = vadd.f32 %v1897_v51, %v1828_v13  ;;  %v2430_v6 = vadd.f32 %v2398_v43, %v2329_v0  ;;  %v2468_v8 = vadd.f32 %v3293_v29, %v2429_v53  ;;  %v2098_v15 = vmul.f32 %v3598_v7, %v1760_v34 }
 0x154   : > { %v1829_v11 = vadd.f32 %v1797_v24, %v1728_v54  ;;  %v1830_v17 = vadd.f32 %v1798_v48, %v1729_v58  ;;  %v2029_v9 = vadd.f32 %v1997_v3, %v1928_v50  ;;  %v2099_v33 = vmul.f32 %v3598_v7, %v1761_v57 }
 0x155   : > { %v2030_v2 = vadd.f32 %v1998_v38, %v1929_v30  ;;  %v2469_v59 = vadd.f32 %v3293_v29, %v2430_v6  ;;  %v2500_v60 = vmax.f32 %v2468_v8, 0.0  ;;  %v2198_v14 = vmul.f32 %v3607_v20, %v1559_v28  ;;  %v1563_v6 = vld [vmem:[#allocation2 + $0x140] sm:$0xff] }
 0x156   : > { %v2229_v12 = vadd.f32 %v3568_v62, %v2128_v27  ;;  %v2130_v46 = vadd.f32 %v2098_v15, %v2029_v9  ;;  %v2298_v37 = vmul.f32 %v3254_v49, %v1659_v26  ;;  %v2299_v10 = vmul.f32 %v3254_v49, %v1660_v4  ;;  %v1661_v26 = vld [vmem:[#allocation2 + $0x121] sm:$0xff] }
 0x157   : > { %v3631_v35 = vadd.f32 %v2099_v33, %v2030_v2  ;;  %v2501_v19 = vmax.f32 %v2469_v59, 0.0  ;;  %2532 = vst.msk [vmem:[%s3315_s6 + $0x80] sm:$0xff] %vm273_vm4, %v2500_v60  ;;  %v2230_v23 = vadd.f32 %v2198_v14, %v2129_v56  ;;  %v2399_v62 = vmul.f32 %v3640_v55, %v1760_v34  ;;  %v1762_v27 = vld [vmem:[#allocation2 + $0x122] sm:$0xff]  ;;  %v1663_v2 = vld [vmem:[#allocation2 + $0x139] sm:$0xff] }
 0x158   : > { %v2400_v28 = vmul.f32 %v3640_v55, %v1761_v57  ;;  %v2330_v22 = vadd.f32 %v2298_v37, %v2229_v12  ;;  %v1597_v13 = vmul.f32 %v3553_v5, %v1560_v31  ;;  %v1898_v49 = vmul.f32 %v3559_v32, %v1560_v31  ;;  %v1763_v57 = vld [vmem:[#allocation2 + $0x12a] sm:$0xff]  ;;  %v1664_v14 = vld [vmem:[#allocation2 + $0x141] sm:$0xff] }
 0x159   : > { %v2199_v18 = vmul.f32 %v3607_v20, %v1560_v31  ;;  %2533 = vst.msk [vmem:[%s3315_s6 + $0x88] sm:$0xff] %vm273_vm4, %v2501_v19  ;;  %v2331_v25 = vadd.f32 %v2299_v10, %v2230_v23  ;;  %v1599_v40 = vmul.f32 %v3553_v5, %v1562_v63  ;;  %v1900_v4 = vmul.f32 %v3559_v32, %v1562_v63  ;;  %v1764_v12 = vld [vmem:[#allocation2 + $0x13a] sm:$0xff]  ;;  %v1765_v31 = vld [vmem:[#allocation2 + $0x142] sm:$0xff] }
 0x15a   : > { %v3652_v34 = vmul.f32 %v3607_v20, %v1562_v63  ;;  %v2431_v41 = vadd.f32 %v2399_v62, %v2330_v22  ;;  %v1930_v42 = vadd.f32 %v1898_v49, %v1829_v11  ;;  %v1598_v44 = vmul.f32 %v3553_v5, %v1561_v39 }
 0x15b   : > { %v2231_v43 = vadd.f32 %v2199_v18, %v2130_v46  ;;  %v2432_v56 = vadd.f32 %v2400_v28, %v2331_v25  ;;  %v1698_v45 = vmul.f32 %v3574_v61, %v1661_v26  ;;  %v1699_v47 = vmul.f32 %v3574_v61, %v1662_v36 }
 0x15c   : > { %v1799_v21 = vmul.f32 %v3581_v1, %v1762_v27  ;;  %v2470_v16 = vadd.f32 %v3293_v29, %v2431_v41  ;;  %v1800_v24 = vmul.f32 %v3581_v1, %v1763_v57  ;;  %v1899_v48 = vmul.f32 %v3559_v32, %v1561_v39 }
 0x15d   : > { %v1999_v51 = vmul.f32 %v3592_v52, %v1661_v26  ;;  %v2471_v0 = vadd.f32 %v3293_v29, %v2432_v56  ;;  %v1730_v53 = vadd.f32 %v1698_v45, %v1597_v13  ;;  %v1731_v54 = vadd.f32 %v1699_v47, %v1598_v44 }
 0x15e   : > { %v2000_v50 = vmul.f32 %v3592_v52, %v1662_v36  ;;  %v2502_v58 = vmax.f32 %v2470_v16, 0.0  ;;  %v1931_v30 = vadd.f32 %v1899_v48, %v1830_v17  ;;  %v2100_v38 = vmul.f32 %v3598_v7, %v1762_v27  ;;  %v3672_v17 = vld [vmem:[%s3803_s2 + $0x7] ss:$0 sm:$0xff] }
 0x15f   : > { %v2031_v3 = vadd.f32 %v1999_v51, %v1930_v42  ;;  %v2503_v8 = vmax.f32 %v2471_v0, 0.0  ;;  %v1831_v11 = vadd.f32 %v1799_v21, %v1730_v53  ;;  %v1832_v15 = vadd.f32 %v1800_v24, %v1731_v54  ;;  %v1564_v0 = vld [vmem:[#allocation2 + $0x150] sm:$0xff] }
 0x160   : > { %v2101_v9 = vmul.f32 %v3598_v7, %v1763_v57  ;;  %2534 = vst.msk [vmem:[%s3315_s6 + $0x90] sm:$0xff] %vm273_vm4, %v2502_v58  ;;  %v2032_v29 = vadd.f32 %v2000_v50, %v1931_v30  ;;  %v2200_v59 = vmul.f32 %v3607_v20, %v1561_v39  ;;  %v2300_v60 = vmul.f32 %v3672_v17, %v1661_v26  ;;  %v1566_v30 = vld [vmem:[#allocation2 + $0x168] sm:$0xff] }
 0x161   : > { %v2132_v33 = vadd.f32 %v2100_v38, %v2031_v3  ;;  %2535 = vst.msk [vmem:[%s3315_s6 + $0x98] sm:$0xff] %vm273_vm4, %v2503_v8  ;;  %v2301_v46 = vmul.f32 %v3672_v17, %v1662_v36  ;;  %v2401_v37 = vmul.f32 %v3640_v55, %v1762_v27  ;;  %v2402_v10 = vmul.f32 %v3640_v55, %v1763_v57 }
 0x162   : > { %v1600_v63 = vmul.f32 %v3553_v5, %v1563_v6  ;;  %v2133_v19 = vadd.f32 %v2101_v9, %v2032_v29  ;;  %v2232_v23 = vadd.f32 %v2200_v59, %v3631_v35  ;;  %v2332_v62 = vadd.f32 %v2300_v60, %v2231_v43  ;;  %v3692_v43 = vld [vmem:[%s3804_s3] ss:$0 sm:$0xff]  ;;  %v1665_v29 = vld [vmem:[#allocation2 + $0x151] sm:$0xff] }
 0x163   : > { %v1700_v28 = vmul.f32 %v3574_v61, %v1663_v2  ;;  %v1701_v39 = vmul.f32 %v3574_v61, %v1664_v14  ;;  %v1801_v22 = vmul.f32 %v3581_v1, %v1764_v12  ;;  %v1802_v13 = vmul.f32 %v3581_v1, %v1765_v31  ;;  %v1766_v59 = vld [vmem:[#allocation2 + $0x152] sm:$0xff] }
 0x164   : > { %v1901_v49 = vmul.f32 %v3559_v32, %v1563_v6  ;;  %v2333_v18 = vadd.f32 %v2301_v46, %v2232_v23  ;;  %v2433_v26 = vadd.f32 %v2401_v37, %v2332_v62  ;;  %v1932_v27 = vadd.f32 %v1900_v4, %v1831_v11  ;;  %v1565_v11 = vld [vmem:[#allocation2 + $0x158] sm:$0xff] }
 0x165   : > { %v1732_v36 = vadd.f32 %v1700_v28, %v1599_v40  ;;  %v1733_v25 = vadd.f32 %v1701_v39, %v1600_v63  ;;  %v2001_v41 = vmul.f32 %v3592_v52, %v1663_v2  ;;  %v2002_v35 = vmul.f32 %v3592_v52, %v1664_v14  ;;  %v1767_v46 = vld [vmem:[#allocation2 + $0x15a] sm:$0xff] }
 0x166   : > { %v1933_v57 = vadd.f32 %v1901_v49, %v1832_v15  ;;  %v2434_v42 = vadd.f32 %v2402_v10, %v2333_v18  ;;  %v2472_v44 = vadd.f32 %v3692_v43, %v2433_v26  ;;  %v2102_v45 = vmul.f32 %v3598_v7, %v1764_v12 }
 0x167   : > { %v1833_v56 = vadd.f32 %v1801_v22, %v1732_v36  ;;  %v1834_v40 = vadd.f32 %v1802_v13, %v1733_v25  ;;  %v2033_v4 = vadd.f32 %v2001_v41, %v1932_v27  ;;  %v2103_v21 = vmul.f32 %v3598_v7, %v1765_v31 }
 0x168   : > { %v2034_v47 = vadd.f32 %v2002_v35, %v1933_v57  ;;  %v2473_v16 = vadd.f32 %v3692_v43, %v2434_v42  ;;  %v2504_v24 = vmax.f32 %v2472_v44, 0.0  ;;  %v2202_v48 = vmul.f32 %v3607_v20, %v1563_v6  ;;  %v1567_v44 = vld [vmem:[#allocation2 + $0x170] sm:$0xff] }
 0x169   : > { %v2233_v51 = vadd.f32 %v3652_v34, %v2132_v33  ;;  %v2134_v53 = vadd.f32 %v2102_v45, %v2033_v4  ;;  %v2302_v50 = vmul.f32 %v3672_v17, %v1663_v2  ;;  %v2303_v58 = vmul.f32 %v3672_v17, %v1664_v14  ;;  %v1666_v33 = vld [vmem:[#allocation2 + $0x159] sm:$0xff] }
 0x16a   : > { %v3700_v54 = vadd.f32 %v2103_v21, %v2034_v47  ;;  %v2505_v3 = vmax.f32 %v2473_v16, 0.0  ;;  %2536 = vst.msk [vmem:[%s3315_s6 + $0xa0] sm:$0xff] %vm273_vm4, %v2504_v24  ;;  %v2234_v38 = vadd.f32 %v2202_v48, %v2133_v19  ;;  %v2403_v8 = vmul.f32 %v3640_v55, %v1764_v12  ;;  %v1667_v21 = vld [vmem:[#allocation2 + $0x169] sm:$0xff] }
 0x16b   : > { %v2404_v6 = vmul.f32 %v3640_v55, %v1765_v31  ;;  %v2334_v34 = vadd.f32 %v2302_v50, %v2233_v51  ;;  %v1601_v15 = vmul.f32 %v3553_v5, %v1564_v0  ;;  %v1902_v9 = vmul.f32 %v3559_v32, %v1564_v0 }
 0x16c   : > { %v2203_v2 = vmul.f32 %v3607_v20, %v1564_v0  ;;  %2537 = vst.msk [vmem:[%s3315_s6 + $0xa8] sm:$0xff] %vm273_vm4, %v2505_v3  ;;  %v2335_v60 = vadd.f32 %v2303_v58, %v2234_v38  ;;  %v1603_v14 = vmul.f32 %v3553_v5, %v1566_v30  ;;  %v1904_v12 = vmul.f32 %v3559_v32, %v1566_v30  ;;  %v1768_v0 = vld [vmem:[#allocation2 + $0x16a] sm:$0xff] }
 0x16d   : > { %v3716_v31 = vmul.f32 %v3607_v20, %v1566_v30  ;;  %v2435_v37 = vadd.f32 %v2403_v8, %v2334_v34  ;;  %v1934_v10 = vadd.f32 %v1902_v9, %v1833_v56  ;;  %v1602_v19 = vmul.f32 %v3553_v5, %v1565_v11 }
 0x16e   : > { %v2235_v63 = vadd.f32 %v2203_v2, %v2134_v53  ;;  %v2436_v23 = vadd.f32 %v2404_v6, %v2335_v60  ;;  %v1702_v62 = vmul.f32 %v3574_v61, %v1665_v29  ;;  %v1703_v28 = vmul.f32 %v3574_v61, %v1666_v33  ;;  %v1769_v53 = vld [vmem:[#allocation2 + $0x172] sm:$0xff] }
 0x16f   : > { %v1803_v39 = vmul.f32 %v3581_v1, %v1766_v59  ;;  %v2474_v22 = vadd.f32 %v3692_v43, %v2435_v37  ;;  %v1804_v13 = vmul.f32 %v3581_v1, %v1767_v46  ;;  %v1903_v49 = vmul.f32 %v3559_v32, %v1565_v11 }
 0x170   : > { %v2003_v18 = vmul.f32 %v3592_v52, %v1665_v29  ;;  %v2475_v26 = vadd.f32 %v3692_v43, %v2436_v23  ;;  %v1734_v36 = vadd.f32 %v1702_v62, %v1601_v15  ;;  %v1735_v27 = vadd.f32 %v1703_v28, %v1602_v19 }
 0x171   : > { %v2004_v25 = vmul.f32 %v3592_v52, %v1666_v33  ;;  %v2506_v57 = vmax.f32 %v2474_v22, 0.0  ;;  %v1935_v41 = vadd.f32 %v1903_v49, %v1834_v40  ;;  %v2104_v42 = vmul.f32 %v3598_v7, %v1766_v59  ;;  %v1668_v40 = vld [vmem:[#allocation2 + $0x171] sm:$0xff]  ;;  %v1870_v49 = vld [vmem:[#allocation2 + $0x188] sm:$0xff] }
 0x172   : > { %v2035_v35 = vadd.f32 %v2003_v18, %v1934_v10  ;;  %v2507_v56 = vmax.f32 %v2475_v26, 0.0  ;;  %v1835_v45 = vadd.f32 %v1803_v39, %v1734_v36  ;;  %v1836_v4 = vadd.f32 %v1804_v13, %v1735_v27  ;;  %v1869_v13 = vld [vmem:[#allocation2 + $0x180] sm:$0xff] }
 0x173   : > { %v2105_v47 = vmul.f32 %v3598_v7, %v1767_v46  ;;  %2538 = vst.msk [vmem:[%s3315_s6 + $0xb0] sm:$0xff] %vm273_vm4, %v2506_v57  ;;  %v2036_v16 = vadd.f32 %v2004_v25, %v1935_v41  ;;  %v2204_v48 = vmul.f32 %v3607_v20, %v1565_v11  ;;  %v2304_v51 = vmul.f32 %v3672_v17, %v1665_v29  ;;  %v1970_v25 = vld [vmem:[#allocation2 + $0x181] sm:$0xff]  ;;  %v1971_v57 = vld [vmem:[#allocation2 + $0x189] sm:$0xff] }
 0x174   : > { %v2136_v24 = vadd.f32 %v2104_v42, %v2035_v35  ;;  %2539 = vst.msk [vmem:[%s3315_s6 + $0xb8] sm:$0xff] %vm273_vm4, %v2507_v56  ;;  %v2305_v50 = vmul.f32 %v3672_v17, %v1666_v33  ;;  %v2405_v58 = vmul.f32 %v3640_v55, %v1766_v59  ;;  %v2406_v30 = vmul.f32 %v3640_v55, %v1767_v46  ;;  %v2071_v41 = vld [vmem:[#allocation2 + $0x182] sm:$0xff] }
 0x175   : > { %v1604_v3 = vmul.f32 %v3553_v5, %v1567_v44  ;;  %v2137_v38 = vadd.f32 %v2105_v47, %v2036_v16  ;;  %v2236_v8 = vadd.f32 %v2204_v48, %v3700_v54  ;;  %v2336_v6 = vadd.f32 %v2304_v51, %v2235_v63 }
 0x176   : > { %v1704_v11 = vmul.f32 %v3574_v61, %v1667_v21  ;;  %v1705_v34 = vmul.f32 %v3574_v61, %v1668_v40  ;;  %v1805_v15 = vmul.f32 %v3581_v1, %v1768_v0  ;;  %v1806_v9 = vmul.f32 %v3581_v1, %v1769_v53 }
 0x177   : > { %v1905_v2 = vmul.f32 %v3559_v32, %v1567_v44  ;;  %v2337_v29 = vadd.f32 %v2305_v50, %v2236_v8  ;;  %v2437_v33 = vadd.f32 %v2405_v58, %v2336_v6  ;;  %v1936_v60 = vadd.f32 %v1904_v12, %v1835_v45 }
 0x178   : > { %v1736_v59 = vadd.f32 %v1704_v11, %v1603_v14  ;;  %v1737_v46 = vadd.f32 %v1705_v34, %v1604_v3  ;;  %v2005_v37 = vmul.f32 %v3592_v52, %v1667_v21  ;;  %v2006_v54 = vmul.f32 %v3592_v52, %v1668_v40 }
 0x179   : > { %v1937_v5 = vadd.f32 %v1905_v2, %v1836_v4  ;;  %v2438_v10 = vadd.f32 %v2406_v30, %v2337_v29  ;;  %v2476_v63 = vadd.f32 %v3692_v43, %v2437_v33  ;;  %v2106_v19 = vmul.f32 %v3598_v7, %v1768_v0 }
 0x17a   : > { %v1837_v61 = vadd.f32 %v1805_v15, %v1736_v59  ;;  %v1838_v23 = vadd.f32 %v1806_v9, %v1737_v46  ;;  %v2037_v1 = vadd.f32 %v2005_v37, %v1936_v60  ;;  %v2107_v28 = vmul.f32 %v3598_v7, %v1769_v53  ;;  %v2273_v46 = vld [vmem:[#allocation2 + $0x199] sm:$0xff] }
 0x17b   : > { %v2038_v62 = vadd.f32 %v2006_v54, %v1937_v5  ;;  %v2477_v14 = vadd.f32 %v3692_v43, %v2438_v10  ;;  %v2508_v12 = vmax.f32 %v2476_v63, 0.0  ;;  %v2206_v39 = vmul.f32 %v3607_v20, %v1567_v44  ;;  %v2274_v63 = vld [vmem:[#allocation2 + $0x1a1] sm:$0xff] }
 0x17c   : > { %v2237_v22 = vadd.f32 %v3716_v31, %v2136_v24  ;;  %v2138_v18 = vadd.f32 %v2106_v19, %v2037_v1  ;;  %v2306_v36 = vmul.f32 %v3672_v17, %v1667_v21  ;;  %v2307_v27 = vmul.f32 %v3672_v17, %v1668_v40  ;;  %v2072_v21 = vld [vmem:[#allocation2 + $0x18a] sm:$0xff]  ;;  %v2374_v19 = vld [vmem:[#allocation2 + $0x19a] sm:$0xff] }
 0x17d   : > { %v2139_v26 = vadd.f32 %v2107_v28, %v2038_v62  ;;  %v2509_v35 = vmax.f32 %v2477_v14, 0.0  ;;  %2540 = vst.msk [vmem:[%s3315_s6 + $0xc0] sm:$0xff] %vm273_vm4, %v2508_v12  ;;  %v2238_v42 = vadd.f32 %v2206_v39, %v2137_v38  ;;  %v2407_v44 = vmul.f32 %v3640_v55, %v1768_v0  ;;  %v2375_v14 = vld [vmem:[#allocation2 + $0x1a2] sm:$0xff] }
 0x17e   : > { %v2408_v31 = vmul.f32 %v3640_v55, %v1769_v53  ;;  %v2338_v56 = vadd.f32 %v2306_v36, %v2237_v22  ;;  %v1906_v45 = vmul.f32 %v3559_v32, %v1869_v13  ;;  %v2207_v4 = vmul.f32 %v3607_v20, %v1869_v13 }
 0x17f   : > { %v1907_v47 = vmul.f32 %v3559_v32, %v1870_v49  ;;  %2541 = vst.msk [vmem:[%s3315_s6 + $0xc8] sm:$0xff] %vm273_vm4, %v2509_v35  ;;  %v2339_v16 = vadd.f32 %v2307_v27, %v2238_v42  ;;  %v2007_v24 = vmul.f32 %v3592_v52, %v1970_v25  ;;  %v2008_v48 = vmul.f32 %v3592_v52, %v1971_v57  ;;  %v2172_v52 = vld [vmem:[#allocation2 + $0x198] sm:$0xff] }
 0x180   : > { %v2108_v51 = vmul.f32 %v3598_v7, %v2071_v41  ;;  %v2439_v40 = vadd.f32 %v2407_v44, %v2338_v56  ;;  %v1938_v0 = vadd.f32 %v1906_v45, %v1837_v61  ;;  %v2239_v53 = vadd.f32 %v2207_v4, %v2138_v18 }
 0x181   : > { %v1939_v50 = vadd.f32 %v1907_v47, %v1838_v23  ;;  %v2440_v58 = vadd.f32 %v2408_v31, %v2339_v16  ;;  %v2109_v30 = vmul.f32 %v3598_v7, %v2072_v21  ;;  %v2208_v3 = vmul.f32 %v3607_v20, %v1870_v49  ;;  %v2173_v7 = vld [vmem:[#allocation2 + $0x1a0] sm:$0xff] }
 0x182   : > { %v2308_v32 = vmul.f32 %v3672_v17, %v1970_v25  ;;  %v2478_v38 = vadd.f32 %v3692_v43, %v2439_v40  ;;  %v2039_v8 = vadd.f32 %v2007_v24, %v1938_v0  ;;  %v2309_v11 = vmul.f32 %v3672_v17, %v1971_v57 }
 0x183   : > { %v2040_v6 = vadd.f32 %v2008_v48, %v1939_v50  ;;  %v2479_v34 = vadd.f32 %v3692_v43, %v2440_v58  ;;  %v2240_v15 = vadd.f32 %v2208_v3, %v2139_v26  ;;  %v2409_v2 = vmul.f32 %v3640_v55, %v2071_v41 }
 0x184   : > { %v2340_v9 = vadd.f32 %v2308_v32, %v2239_v53  ;;  %v2510_v29 = vmax.f32 %v2478_v38, 0.0  ;;  %v2140_v33 = vadd.f32 %v2108_v51, %v2039_v8  ;;  %v2410_v60 = vmul.f32 %v3640_v55, %v2072_v21 }
 0x185   : > { %v2141_v59 = vadd.f32 %v2109_v30, %v2040_v6  ;;  %v2511_v5 = vmax.f32 %v2479_v34, 0.0  ;;  %v2341_v37 = vadd.f32 %v2309_v11, %v2240_v15  ;;  %v2209_v10 = vmul.f32 %v3607_v20, %v2172_v52 }
 0x186   : > { %v2441_v54 = vadd.f32 %v2409_v2, %v2340_v9  ;;  %2542 = vst.msk [vmem:[%s3315_s6 + $0xd0] sm:$0xff] %vm273_vm4, %v2510_v29  ;;  %v2210_v61 = vmul.f32 %v3607_v20, %v2173_v7  ;;  %v2310_v28 = vmul.f32 %v3672_v17, %v2273_v46  ;;  %v2311_v39 = vmul.f32 %v3672_v17, %v2274_v63 }
 0x187   : > { %2543 = vst.msk [vmem:[%s3315_s6 + $0xd8] sm:$0xff] %vm273_vm4, %v2511_v5  ;;  %v2442_v23 = vadd.f32 %v2410_v60, %v2341_v37  ;;  %v2241_v62 = vadd.f32 %v2209_v10, %v2140_v33  ;;  %v2411_v49 = vmul.f32 %v3640_v55, %v2374_v19  ;;  %v2412_v26 = vmul.f32 %v3640_v55, %v2375_v14 }
 0x188   : > { %v2480_v1 = vadd.f32 %v3692_v43, %v2441_v54  ;;  %v2242_v12 = vadd.f32 %v2210_v61, %v2141_v59 }
 0x189   : > { %v2481_v22 = vadd.f32 %v3692_v43, %v2442_v23  ;;  %v2342_v13 = vadd.f32 %v2310_v28, %v2241_v62 }
 0x18a   : > { %v2512_v20 = vmax.f32 %v2480_v1, 0.0  ;;  %v2343_v18 = vadd.f32 %v2311_v39, %v2242_v12 }
 0x18b   : > { %v2513_v36 = vmax.f32 %v2481_v22, 0.0  ;;  %v2443_v27 = vadd.f32 %v2411_v49, %v2342_v13 }
 0x18c   : > { %2544 = vst.msk [vmem:[%s3315_s6 + $0xe0] sm:$0xff] %vm273_vm4, %v2512_v20  ;;  %v2444_v25 = vadd.f32 %v2412_v26, %v2343_v18 }
 0x18d   : > { %2545 = vst.msk [vmem:[%s3315_s6 + $0xe8] sm:$0xff] %vm273_vm4, %v2513_v36  ;;  %v2482_v17 = vadd.f32 %v3692_v43, %v2443_v27 }
 0x18e   : > { %v2483_v57 = vadd.f32 %v3692_v43, %v2444_v25 }
 0x18f   : > { %v2514_v41 = vmax.f32 %v2482_v17, 0.0 }
 0x190   : > { %v2515_v35 = vmax.f32 %v2483_v57, 0.0 }
 0x191   : > { %2546 = vst.msk [vmem:[%s3315_s6 + $0xf0] sm:$0xff] %vm273_vm4, %v2514_v41 }
 0x192   : > { %2547 = vst.msk [vmem:[%s3315_s6 + $0xf8] sm:$0xff] %vm273_vm4, %v2515_v35 }
 0x193 PF: > { %s14_s15 = sadd.s32 1, %s2971_s15  }
 0x194   : > { %p11_p4 = scmp.ge.s32.totalorder %s14_s15, 4  }
 0x196   :  { %13 = sbr.rel (!%p11_p4) target bundleno = 1 (0x1), region = 100 }

</bundles_post_ra>
